<compile_context>
chip_gen: v6e
topology: v6e:2x2x1
jax: 0.10.0
libtpu: 0.0.40
codegen_flags: <defaults>
</compile_context>

<pallas_src>
import functools
from collections import namedtuple

import jax
import jax.numpy as jnp
from jax.experimental import pallas as pl
from jax.experimental.pallas import tpu as pltpu


# ---------------------------------------------------------------------------
# Pallas kernels
# ---------------------------------------------------------------------------
def _conv3x3_kernel(x_ref, w_ref, b_ref, o_ref, acc_ref, *, wstride):
    """Fused 3x3 conv (9 shifted MXU matmuls) + bias + ReLU, one image / Cout tile.

    x_ref:   (1, (H+3)*(W+2), Cin)  bf16  flattened zero-padded image
    w_ref:   (9, Cin, TCO)          bf16  per-tap weight slabs (dy*3+dx order)
    b_ref:   (1, TCO)               f32
    o_ref:   (1, H*(W+2), TCO)      bf16  flat output (2 junk cols per row)
    acc_ref: (H*(W+2), TCO)         f32   VMEM accumulator
    """
    m = acc_ref.shape[0]
    for dy in range(3):
        for dx in range(3):
            t = dy * 3 + dx
            # Shifted view of the flattened padded image: row r of this slice
            # is padded pixel (y+dy, x+dx) for output row r = y*(W+2)+x.
            xs = x_ref[0, pl.ds(dy * wstride + dx, m), :]
            contrib = jnp.dot(xs, w_ref[t], preferred_element_type=jnp.float32)
            if t == 0:
                acc_ref[...] = contrib
            else:
                acc_ref[...] += contrib
    o_ref[0] = jnp.maximum(acc_ref[...] + b_ref[...], 0.0).astype(o_ref.dtype)


def _maxpool2x2_kernel(x_ref, o_ref, *, c):
    """2x2/stride-2 maxpool for a block of output rows.

    x_ref: (1, 2*RB, Wo, 2*C)  column pairs pre-merged onto the lane axis
    o_ref: (1, RB, Wo, C)
    """
    for i in range(o_ref.shape[1]):
        rm = jnp.maximum(x_ref[0, 2 * i], x_ref[0, 2 * i + 1])   # (Wo, 2C)
        o_ref[0, i] = jnp.maximum(rm[:, :c], rm[:, c:])


# ---------------------------------------------------------------------------
# Wrappers
# ---------------------------------------------------------------------------
def conv3x3_relu(x, w, b):
    """x: (N,H,W,Cin) bf16; w: (3,3,Cin,Cout) f32; b: (Cout,) -> (N,H,W,Cout) bf16."""
    x = x.astype(jnp.bfloat16)
    N, H, W, Cin = x.shape
    Cout = w.shape[-1]
    cpad = (-Cin) % 8            # pad the K dim to a sublane multiple (conv1_1)
    Ck = Cin + cpad
    Wp = W + 2                   # padded width
    Mp = (H + 3) * Wp            # flat padded rows / image (1 top + 2 bottom pad)
    M = H * Wp                   # output rows computed / image (2 junk cols/row)
    tco = min(Cout, 256)
    n_co = Cout // tco

    # One pad pass: spatial zero-pad + channel pad; reshape to flat rows (free).
    xp = jnp.pad(x, ((0, 0), (1, 2), (1, 1), (0, cpad)))
    xf = xp.reshape(N, Mp, Ck)
    wf = jnp.pad(w, ((0, 0), (0, 0), (0, cpad), (0, 0))).astype(jnp.bfloat16)
    wf = wf.reshape(9, Ck, Cout)
    bf = b.astype(jnp.float32).reshape(1, Cout)

    kern = functools.partial(_conv3x3_kernel, wstride=Wp)
    out = pl.pallas_call(
        kern,
        out_shape=jax.ShapeDtypeStruct((N, M, Cout), jnp.bfloat16),
        grid=(N, n_co),
        in_specs=[
            pl.BlockSpec((1, Mp, Ck), lambda n, j: (n, 0, 0)),
            pl.BlockSpec((9, Ck, tco), lambda n, j: (0, 0, j)),
            pl.BlockSpec((1, tco), lambda n, j: (0, j)),
        ],
        out_specs=pl.BlockSpec((1, M, tco), lambda n, j: (n, 0, j)),
        scratch_shapes=[pltpu.VMEM((M, tco), jnp.float32)],
        compiler_params=pltpu.CompilerParams(
            dimension_semantics=("parallel", "parallel"),
        ),
    )(xf, wf, bf)
    # Drop the 2 junk columns introduced by the width padding.
    return out.reshape(N, H, Wp, Cout)[:, :, :W, :]


def maxpool2x2(x):
    """x: (N, H, W, C) bf16 -> (N, H//2, W//2, C) bf16."""
    N, H, W, C = x.shape
    Ho, Wo = H // 2, W // 2
    xr = x.reshape(N, H, Wo, 2 * C)   # free reshape: column pair -> lane axis
    rb = 1                            # output row-pairs per grid step
    for d in range(1, 9):
        if Ho % d == 0:
            rb = d

    kern = functools.partial(_maxpool2x2_kernel, c=C)
    return pl.pallas_call(
        kern,
        out_shape=jax.ShapeDtypeStruct((N, Ho, Wo, C), x.dtype),
        grid=(N, Ho // rb),
        in_specs=[pl.BlockSpec((1, 2 * rb, Wo, 2 * C), lambda n, t: (n, t, 0, 0))],
        out_specs=pl.BlockSpec((1, rb, Wo, C), lambda n, t: (n, t, 0, 0)),
        compiler_params=pltpu.CompilerParams(
            dimension_semantics=("parallel", "parallel"),
        ),
    )(xr)


# ---------------------------------------------------------------------------
# Pure-JAX references for self-checks (bf16 inputs, f32 accumulation)
# ---------------------------------------------------------------------------
def _conv_ref(x, w, b):
    n, h, wd, _ = x.shape
    xp = jnp.pad(x.astype(jnp.bfloat16), ((0, 0), (1, 1), (1, 1), (0, 0)))
    wb = w.astype(jnp.bfloat16)
    acc = jnp.zeros((n, h, wd, w.shape[-1]), jnp.float32)
    for dy in range(3):
        for dx in range(3):
            acc = acc + jnp.einsum(
                "nhwc,co->nhwo",
                xp[:, dy:dy + h, dx:dx + wd, :], wb[dy, dx],
                preferred_element_type=jnp.float32)
    return jnp.maximum(acc + b.reshape(1, 1, 1, -1), 0.0).astype(jnp.bfloat16)


def _pool_ref(x):
    n, h, wd, c = x.shape
    return x.reshape(n, h // 2, 2, wd // 2, 2, c).max(axis=(2, 4))


# ---------------------------------------------------------------------------
# Parameters (deterministic synthetic init; shapes of vgg16.features convs)
# ---------------------------------------------------------------------------
_VGG_CONV_CFG = [
    (3, 64), (64, 64),                       # slice1
    (64, 128), (128, 128),                   # slice2
    (128, 256), (256, 256), (256, 256),      # slice3
    (256, 512), (512, 512), (512, 512),      # slice4
    (512, 512), (512, 512), (512, 512),      # slice5
]


def init_vgg16_params(key):
    params = []
    for cin, cout in _VGG_CONV_CFG:
        key, kw, kb = jax.random.split(key, 3)
        std = (2.0 / (9.0 * cin)) ** 0.5
        w = jax.random.normal(kw, (3, 3, cin, cout), jnp.float32) * std
        bb = jax.random.normal(kb, (cout,), jnp.float32) * 0.01
        params.append((w, bb))
    return params


# ---------------------------------------------------------------------------
# Forward pass (mirrors vgg16.forward: 5 slices, returns the 5 relu outputs)
# ---------------------------------------------------------------------------
VggOutputs = namedtuple(
    "VggOutputs", ["relu1_2", "relu2_2", "relu3_3", "relu4_3", "relu5_3"]
)


def vgg16_forward(x_nchw, params):
    h = jnp.transpose(x_nchw, (0, 2, 3, 1)).astype(jnp.bfloat16)  # NCHW -> NHWC bf16

    def conv(t, i):
        w, b = params[i]
        return conv3x3_relu(t, w, b)

    h = conv(h, 0); h = conv(h, 1); relu1_2 = h
    h = maxpool2x2(h); h = conv(h, 2); h = conv(h, 3); relu2_2 = h
    h = maxpool2x2(h); h = conv(h, 4); h = conv(h, 5); h = conv(h, 6); relu3_3 = h
    h = maxpool2x2(h); h = conv(h, 7); h = conv(h, 8); h = conv(h, 9); relu4_3 = h
    h = maxpool2x2(h); h = conv(h, 10); h = conv(h, 11); h = conv(h, 12); relu5_3 = h

    to_nchw_f32 = lambda t: jnp.transpose(t, (0, 3, 1, 2)).astype(jnp.float32)
    return VggOutputs(to_nchw_f32(relu1_2), to_nchw_f32(relu2_2),
                      to_nchw_f32(relu3_3), to_nchw_f32(relu4_3),
                      to_nchw_f32(relu5_3))


# ---------------------------------------------------------------------------
if __name__ == "__main__":
    # --- small kernel self-checks against pure-JAX references --------------
    kx, kw, kb = jax.random.split(jax.random.PRNGKey(1), 3)
    xs = jax.random.normal(kx, (2, 8, 8, 16), jnp.float32).astype(jnp.bfloat16)
    ws = jax.random.normal(kw, (3, 3, 16, 32), jnp.float32) * 0.1
    bs = jax.random.normal(kb, (32,), jnp.float32) * 0.01
    got_c = conv3x3_relu(xs, ws, bs)
    ref_c = _conv_ref(xs, ws, bs)
    assert jnp.allclose(got_c.astype(jnp.float32), ref_c.astype(jnp.float32),
                        atol=5e-2, rtol=5e-2), "conv3x3 self-check failed"
    got_p = maxpool2x2(xs)
    ref_p = _pool_ref(xs)
    assert bool(jnp.all(got_p == ref_p)), "maxpool self-check failed"

    # --- full model ---------------------------------------------------------
    key = jax.random.PRNGKey(0)
    k_x, k_p = jax.random.split(key)
    # (N, C, H, W) = (2, 3, 32, 32): 3 input channels; 32x32 keeps all 4
    # poolings valid (relu5_3 spatial = 2x2).
    x = jax.random.normal(k_x, (2, 3, 32, 32), jnp.float32)
    params = init_vgg16_params(k_p)

    fwd = jax.jit(vgg16_forward)
    out = fwd(x, params)
    out = jax.tree_util.tree_map(jax.block_until_ready, out)

    expected = {
        "relu1_2": (2, 64, 32, 32),
        "relu2_2": (2, 128, 16, 16),
        "relu3_3": (2, 256, 8, 8),
        "relu4_3": (2, 512, 4, 4),
        "relu5_3": (2, 512, 2, 2),
    }
    for name, shape in expected.items():
        got = getattr(out, name)
        assert got.shape == shape, (name, got.shape, shape)
        assert got.dtype == jnp.float32
        assert bool(jnp.all(jnp.isfinite(got)))

    print("KERNEL_OK")
</pallas_src>

<mosaic_0001>
module attributes {stable_mosaic.version = 11 : i64} {
  func.func @_conv3x3_kernel(%arg0: i32, %arg1: i32, %arg2: memref<1x110x16xbf16, #tpu.memory_space<vmem>>, %arg3: memref<9x16x32xbf16, #tpu.memory_space<vmem>>, %arg4: memref<1x32xf32, #tpu.memory_space<vmem>>, %arg5: memref<1x80x32xbf16, #tpu.memory_space<vmem>>, %arg6: memref<80x32xf32, #tpu.memory_space<vmem>>) attributes {dimension_semantics = [#tpu.dimension_semantics<parallel>, #tpu.dimension_semantics<parallel>], iteration_bounds = array<i64: 2, 1>, scalar_prefetch = 0 : i64, scratch_operands = 1 : i64, tpu.core_type = #tpu.core_type<tc>, window_params = [{transform_indices = @transform_0, window_bounds = array<i64: 1, 110, 16>}, {transform_indices = @transform_1, window_bounds = array<i64: 9, 16, 32>}, {transform_indices = @transform_2, window_bounds = array<i64: 1, 32>}, {transform_indices = @transform_3, window_bounds = array<i64: 1, 80, 32>}]} {
    %c0 = arith.constant 0 : index
    %c0_0 = arith.constant 0 : index
    %c0_1 = arith.constant 0 : index
    %0 = vector.load %arg2[%c0, %c0_0, %c0_1] : memref<1x110x16xbf16, #tpu.memory_space<vmem>>, vector<1x80x16xbf16>
    %1 = vector.shape_cast %0 : vector<1x80x16xbf16> to vector<80x16xbf16>
    %c0_2 = arith.constant 0 : index
    %c0_3 = arith.constant 0 : index
    %c0_4 = arith.constant 0 : index
    %2 = vector.load %arg3[%c0_2, %c0_3, %c0_4] : memref<9x16x32xbf16, #tpu.memory_space<vmem>>, vector<1x16x32xbf16>
    %3 = vector.shape_cast %2 : vector<1x16x32xbf16> to vector<16x32xbf16>
    %cst = arith.constant dense<0.000000e+00> : vector<80x32xf32>
    %4 = tpu.matmul %1, %3, %cst {dimension_numbers = #tpu.dot_dimension_numbers<[1], [0], [0], [1], [0, 0, 1, 1], [], []>} : vector<80x16xbf16>, vector<16x32xbf16>, vector<80x32xf32> -> vector<80x32xf32>
    %c0_5 = arith.constant 0 : index
    %c0_6 = arith.constant 0 : index
    %5 = vector.load %arg6[%c0_5, %c0_6] : memref<80x32xf32, #tpu.memory_space<vmem>>, vector<80x32xf32>
    tpu.vector_store %arg6[%c0_5, %c0_6], %4 {strides = array<i32>} : memref<80x32xf32, #tpu.memory_space<vmem>>, vector<80x32xf32>,
    %c0_7 = arith.constant 0 : index
    %c1 = arith.constant 1 : index
    %c0_8 = arith.constant 0 : index
    %6 = vector.load %arg2[%c0_7, %c1, %c0_8] : memref<1x110x16xbf16, #tpu.memory_space<vmem>>, vector<1x80x16xbf16>
    %7 = vector.shape_cast %6 : vector<1x80x16xbf16> to vector<80x16xbf16>
    %c1_9 = arith.constant 1 : index
    %c0_10 = arith.constant 0 : index
    %c0_11 = arith.constant 0 : index
    %8 = vector.load %arg3[%c1_9, %c0_10, %c0_11] : memref<9x16x32xbf16, #tpu.memory_space<vmem>>, vector<1x16x32xbf16>
    %9 = vector.shape_cast %8 : vector<1x16x32xbf16> to vector<16x32xbf16>
    %cst_12 = arith.constant dense<0.000000e+00> : vector<80x32xf32>
    %10 = tpu.matmul %7, %9, %cst_12 {dimension_numbers = #tpu.dot_dimension_numbers<[1], [0], [0], [1], [0, 0, 1, 1], [], []>} : vector<80x16xbf16>, vector<16x32xbf16>, vector<80x32xf32> -> vector<80x32xf32>
    %c0_13 = arith.constant 0 : index
    %c0_14 = arith.constant 0 : index
    %11 = vector.load %arg6[%c0_13, %c0_14] : memref<80x32xf32, #tpu.memory_space<vmem>>, vector<80x32xf32>
    %12 = arith.addf %11, %10 : vector<80x32xf32>
    %c0_15 = arith.constant 0 : index
    %c0_16 = arith.constant 0 : index
    %13 = vector.load %arg6[%c0_15, %c0_16] : memref<80x32xf32, #tpu.memory_space<vmem>>, vector<80x32xf32>
    tpu.vector_store %arg6[%c0_15, %c0_16], %12 {strides = array<i32>} : memref<80x32xf32, #tpu.memory_space<vmem>>, vector<80x32xf32>,
    %c0_17 = arith.constant 0 : index
    %c2 = arith.constant 2 : index
    %c0_18 = arith.constant 0 : index
    %14 = vector.load %arg2[%c0_17, %c2, %c0_18] : memref<1x110x16xbf16, #tpu.memory_space<vmem>>, vector<1x80x16xbf16>
    %15 = vector.shape_cast %14 : vector<1x80x16xbf16> to vector<80x16xbf16>
    %c2_19 = arith.constant 2 : index
    %c0_20 = arith.constant 0 : index
    %c0_21 = arith.constant 0 : index
    %16 = vector.load %arg3[%c2_19, %c0_20, %c0_21] : memref<9x16x32xbf16, #tpu.memory_space<vmem>>, vector<1x16x32xbf16>
    %17 = vector.shape_cast %16 : vector<1x16x32xbf16> to vector<16x32xbf16>
    %cst_22 = arith.constant dense<0.000000e+00> : vector<80x32xf32>
    %18 = tpu.matmul %15, %17, %cst_22 {dimension_numbers = #tpu.dot_dimension_numbers<[1], [0], [0], [1], [0, 0, 1, 1], [], []>} : vector<80x16xbf16>, vector<16x32xbf16>, vector<80x32xf32> -> vector<80x32xf32>
    %c0_23 = arith.constant 0 : index
    %c0_24 = arith.constant 0 : index
    %19 = vector.load %arg6[%c0_23, %c0_24] : memref<80x32xf32, #tpu.memory_space<vmem>>, vector<80x32xf32>
    %20 = arith.addf %19, %18 : vector<80x32xf32>
    %c0_25 = arith.constant 0 : index
    %c0_26 = arith.constant 0 : index
    %21 = vector.load %arg6[%c0_25, %c0_26] : memref<80x32xf32, #tpu.memory_space<vmem>>, vector<80x32xf32>
    tpu.vector_store %arg6[%c0_25, %c0_26], %20 {strides = array<i32>} : memref<80x32xf32, #tpu.memory_space<vmem>>, vector<80x32xf32>,
    %c0_27 = arith.constant 0 : index
    %c10 = arith.constant 10 : index
    %c0_28 = arith.constant 0 : index
    %22 = vector.load %arg2[%c0_27, %c10, %c0_28] : memref<1x110x16xbf16, #tpu.memory_space<vmem>>, vector<1x80x16xbf16>
    %23 = vector.shape_cast %22 : vector<1x80x16xbf16> to vector<80x16xbf16>
    %c3 = arith.constant 3 : index
    %c0_29 = arith.constant 0 : index
    %c0_30 = arith.constant 0 : index
    %24 = vector.load %arg3[%c3, %c0_29, %c0_30] : memref<9x16x32xbf16, #tpu.memory_space<vmem>>, vector<1x16x32xbf16>
    %25 = vector.shape_cast %24 : vector<1x16x32xbf16> to vector<16x32xbf16>
    %cst_31 = arith.constant dense<0.000000e+00> : vector<80x32xf32>
    %26 = tpu.matmul %23, %25, %cst_31 {dimension_numbers = #tpu.dot_dimension_numbers<[1], [0], [0], [1], [0, 0, 1, 1], [], []>} : vector<80x16xbf16>, vector<16x32xbf16>, vector<80x32xf32> -> vector<80x32xf32>
    %c0_32 = arith.constant 0 : index
    %c0_33 = arith.constant 0 : index
    %27 = vector.load %arg6[%c0_32, %c0_33] : memref<80x32xf32, #tpu.memory_space<vmem>>, vector<80x32xf32>
    %28 = arith.addf %27, %26 : vector<80x32xf32>
    %c0_34 = arith.constant 0 : index
    %c0_35 = arith.constant 0 : index
    %29 = vector.load %arg6[%c0_34, %c0_35] : memref<80x32xf32, #tpu.memory_space<vmem>>, vector<80x32xf32>
    tpu.vector_store %arg6[%c0_34, %c0_35], %28 {strides = array<i32>} : memref<80x32xf32, #tpu.memory_space<vmem>>, vector<80x32xf32>,
    %c0_36 = arith.constant 0 : index
    %c11 = arith.constant 11 : index
    %c0_37 = arith.constant 0 : index
    %30 = vector.load %arg2[%c0_36, %c11, %c0_37] : memref<1x110x16xbf16, #tpu.memory_space<vmem>>, vector<1x80x16xbf16>
    %31 = vector.shape_cast %30 : vector<1x80x16xbf16> to vector<80x16xbf16>
    %c4 = arith.constant 4 : index
    %c0_38 = arith.constant 0 : index
    %c0_39 = arith.constant 0 : index
    %32 = vector.load %arg3[%c4, %c0_38, %c0_39] : memref<9x16x32xbf16, #tpu.memory_space<vmem>>, vector<1x16x32xbf16>
    %33 = vector.shape_cast %32 : vector<1x16x32xbf16> to vector<16x32xbf16>
    %cst_40 = arith.constant dense<0.000000e+00> : vector<80x32xf32>
    %34 = tpu.matmul %31, %33, %cst_40 {dimension_numbers = #tpu.dot_dimension_numbers<[1], [0], [0], [1], [0, 0, 1, 1], [], []>} : vector<80x16xbf16>, vector<16x32xbf16>, vector<80x32xf32> -> vector<80x32xf32>
    %c0_41 = arith.constant 0 : index
    %c0_42 = arith.constant 0 : index
    %35 = vector.load %arg6[%c0_41, %c0_42] : memref<80x32xf32, #tpu.memory_space<vmem>>, vector<80x32xf32>
    %36 = arith.addf %35, %34 : vector<80x32xf32>
    %c0_43 = arith.constant 0 : index
    %c0_44 = arith.constant 0 : index
    %37 = vector.load %arg6[%c0_43, %c0_44] : memref<80x32xf32, #tpu.memory_space<vmem>>, vector<80x32xf32>
    tpu.vector_store %arg6[%c0_43, %c0_44], %36 {strides = array<i32>} : memref<80x32xf32, #tpu.memory_space<vmem>>, vector<80x32xf32>,
    %c0_45 = arith.constant 0 : index
    %c12 = arith.constant 12 : index
    %c0_46 = arith.constant 0 : index
    %38 = vector.load %arg2[%c0_45, %c12, %c0_46] : memref<1x110x16xbf16, #tpu.memory_space<vmem>>, vector<1x80x16xbf16>
    %39 = vector.shape_cast %38 : vector<1x80x16xbf16> to vector<80x16xbf16>
    %c5 = arith.constant 5 : index
    %c0_47 = arith.constant 0 : index
    %c0_48 = arith.constant 0 : index
    %40 = vector.load %arg3[%c5, %c0_47, %c0_48] : memref<9x16x32xbf16, #tpu.memory_space<vmem>>, vector<1x16x32xbf16>
    %41 = vector.shape_cast %40 : vector<1x16x32xbf16> to vector<16x32xbf16>
    %cst_49 = arith.constant dense<0.000000e+00> : vector<80x32xf32>
    %42 = tpu.matmul %39, %41, %cst_49 {dimension_numbers = #tpu.dot_dimension_numbers<[1], [0], [0], [1], [0, 0, 1, 1], [], []>} : vector<80x16xbf16>, vector<16x32xbf16>, vector<80x32xf32> -> vector<80x32xf32>
    %c0_50 = arith.constant 0 : index
    %c0_51 = arith.constant 0 : index
    %43 = vector.load %arg6[%c0_50, %c0_51] : memref<80x32xf32, #tpu.memory_space<vmem>>, vector<80x32xf32>
    %44 = arith.addf %43, %42 : vector<80x32xf32>
    %c0_52 = arith.constant 0 : index
    %c0_53 = arith.constant 0 : index
    %45 = vector.load %arg6[%c0_52, %c0_53] : memref<80x32xf32, #tpu.memory_space<vmem>>, vector<80x32xf32>
    tpu.vector_store %arg6[%c0_52, %c0_53], %44 {strides = array<i32>} : memref<80x32xf32, #tpu.memory_space<vmem>>, vector<80x32xf32>,
    %c0_54 = arith.constant 0 : index
    %c20 = arith.constant 20 : index
    %c0_55 = arith.constant 0 : index
    %46 = vector.load %arg2[%c0_54, %c20, %c0_55] : memref<1x110x16xbf16, #tpu.memory_space<vmem>>, vector<1x80x16xbf16>
    %47 = vector.shape_cast %46 : vector<1x80x16xbf16> to vector<80x16xbf16>
    %c6 = arith.constant 6 : index
    %c0_56 = arith.constant 0 : index
    %c0_57 = arith.constant 0 : index
    %48 = vector.load %arg3[%c6, %c0_56, %c0_57] : memref<9x16x32xbf16, #tpu.memory_space<vmem>>, vector<1x16x32xbf16>
    %49 = vector.shape_cast %48 : vector<1x16x32xbf16> to vector<16x32xbf16>
    %cst_58 = arith.constant dense<0.000000e+00> : vector<80x32xf32>
    %50 = tpu.matmul %47, %49, %cst_58 {dimension_numbers = #tpu.dot_dimension_numbers<[1], [0], [0], [1], [0, 0, 1, 1], [], []>} : vector<80x16xbf16>, vector<16x32xbf16>, vector<80x32xf32> -> vector<80x32xf32>
    %c0_59 = arith.constant 0 : index
    %c0_60 = arith.constant 0 : index
    %51 = vector.load %arg6[%c0_59, %c0_60] : memref<80x32xf32, #tpu.memory_space<vmem>>, vector<80x32xf32>
    %52 = arith.addf %51, %50 : vector<80x32xf32>
    %c0_61 = arith.constant 0 : index
    %c0_62 = arith.constant 0 : index
    %53 = vector.load %arg6[%c0_61, %c0_62] : memref<80x32xf32, #tpu.memory_space<vmem>>, vector<80x32xf32>
    tpu.vector_store %arg6[%c0_61, %c0_62], %52 {strides = array<i32>} : memref<80x32xf32, #tpu.memory_space<vmem>>, vector<80x32xf32>,
    %c0_63 = arith.constant 0 : index
    %c21 = arith.constant 21 : index
    %c0_64 = arith.constant 0 : index
    %54 = vector.load %arg2[%c0_63, %c21, %c0_64] : memref<1x110x16xbf16, #tpu.memory_space<vmem>>, vector<1x80x16xbf16>
    %55 = vector.shape_cast %54 : vector<1x80x16xbf16> to vector<80x16xbf16>
    %c7 = arith.constant 7 : index
    %c0_65 = arith.constant 0 : index
    %c0_66 = arith.constant 0 : index
    %56 = vector.load %arg3[%c7, %c0_65, %c0_66] : memref<9x16x32xbf16, #tpu.memory_space<vmem>>, vector<1x16x32xbf16>
    %57 = vector.shape_cast %56 : vector<1x16x32xbf16> to vector<16x32xbf16>
    %cst_67 = arith.constant dense<0.000000e+00> : vector<80x32xf32>
    %58 = tpu.matmul %55, %57, %cst_67 {dimension_numbers = #tpu.dot_dimension_numbers<[1], [0], [0], [1], [0, 0, 1, 1], [], []>} : vector<80x16xbf16>, vector<16x32xbf16>, vector<80x32xf32> -> vector<80x32xf32>
    %c0_68 = arith.constant 0 : index
    %c0_69 = arith.constant 0 : index
    %59 = vector.load %arg6[%c0_68, %c0_69] : memref<80x32xf32, #tpu.memory_space<vmem>>, vector<80x32xf32>
    %60 = arith.addf %59, %58 : vector<80x32xf32>
    %c0_70 = arith.constant 0 : index
    %c0_71 = arith.constant 0 : index
    %61 = vector.load %arg6[%c0_70, %c0_71] : memref<80x32xf32, #tpu.memory_space<vmem>>, vector<80x32xf32>
    tpu.vector_store %arg6[%c0_70, %c0_71], %60 {strides = array<i32>} : memref<80x32xf32, #tpu.memory_space<vmem>>, vector<80x32xf32>,
    %c0_72 = arith.constant 0 : index
    %c22 = arith.constant 22 : index
    %c0_73 = arith.constant 0 : index
    %62 = vector.load %arg2[%c0_72, %c22, %c0_73] : memref<1x110x16xbf16, #tpu.memory_space<vmem>>, vector<1x80x16xbf16>
    %63 = vector.shape_cast %62 : vector<1x80x16xbf16> to vector<80x16xbf16>
    %c8 = arith.constant 8 : index
    %c0_74 = arith.constant 0 : index
    %c0_75 = arith.constant 0 : index
    %64 = vector.load %arg3[%c8, %c0_74, %c0_75] : memref<9x16x32xbf16, #tpu.memory_space<vmem>>, vector<1x16x32xbf16>
    %65 = vector.shape_cast %64 : vector<1x16x32xbf16> to vector<16x32xbf16>
    %cst_76 = arith.constant dense<0.000000e+00> : vector<80x32xf32>
    %66 = tpu.matmul %63, %65, %cst_76 {dimension_numbers = #tpu.dot_dimension_numbers<[1], [0], [0], [1], [0, 0, 1, 1], [], []>} : vector<80x16xbf16>, vector<16x32xbf16>, vector<80x32xf32> -> vector<80x32xf32>
    %c0_77 = arith.constant 0 : index
    %c0_78 = arith.constant 0 : index
    %67 = vector.load %arg6[%c0_77, %c0_78] : memref<80x32xf32, #tpu.memory_space<vmem>>, vector<80x32xf32>
    %68 = arith.addf %67, %66 : vector<80x32xf32>
    %c0_79 = arith.constant 0 : index
    %c0_80 = arith.constant 0 : index
    %69 = vector.load %arg6[%c0_79, %c0_80] : memref<80x32xf32, #tpu.memory_space<vmem>>, vector<80x32xf32>
    tpu.vector_store %arg6[%c0_79, %c0_80], %68 {strides = array<i32>} : memref<80x32xf32, #tpu.memory_space<vmem>>, vector<80x32xf32>,
    %c0_81 = arith.constant 0 : index
    %c0_82 = arith.constant 0 : index
    %70 = vector.load %arg6[%c0_81, %c0_82] : memref<80x32xf32, #tpu.memory_space<vmem>>, vector<80x32xf32>
    %c0_83 = arith.constant 0 : index
    %c0_84 = arith.constant 0 : index
    %71 = vector.load %arg4[%c0_83, %c0_84] : memref<1x32xf32, #tpu.memory_space<vmem>>, vector<1x32xf32>
    %72 = vector.broadcast %71 : vector<1x32xf32> to vector<80x32xf32>
    %73 = arith.addf %70, %72 : vector<80x32xf32>
    %cst_85 = arith.constant 0.000000e+00 : f32
    %74 = vector.broadcast %cst_85 : f32 to vector<80x32xf32>
    %75 = arith.maximumf %73, %74 : vector<80x32xf32>
    %76 = arith.truncf %75 : vector<80x32xf32> to vector<80x32xbf16>
    %c0_86 = arith.constant 0 : index
    %c0_87 = arith.constant 0 : index
    %c0_88 = arith.constant 0 : index
    %77 = vector.load %arg5[%c0_86, %c0_87, %c0_88] : memref<1x80x32xbf16, #tpu.memory_space<vmem>>, vector<1x80x32xbf16>
    %78 = vector.shape_cast %77 : vector<1x80x32xbf16> to vector<80x32xbf16>
    %79 = vector.shape_cast %76 : vector<80x32xbf16> to vector<1x80x32xbf16>
    tpu.vector_store %arg5[%c0_86, %c0_87, %c0_88], %79 {strides = array<i32>} : memref<1x80x32xbf16, #tpu.memory_space<vmem>>, vector<1x80x32xbf16>,
    return
  }
  func.func @transform_0(%arg0: i32, %arg1: i32) -> (i32, i32, i32) {
    %c0_i32 = arith.constant 0 : i32
    %c0_i32_0 = arith.constant 0 : i32
    %c0_i32_1 = arith.constant 0 : i32
    return %arg0, %c0_i32, %c0_i32_0 : i32, i32, i32
  }
  func.func @transform_1(%arg0: i32, %arg1: i32) -> (i32, i32, i32) {
    %c0_i32 = arith.constant 0 : i32
    %c0_i32_0 = arith.constant 0 : i32
    %c0_i32_1 = arith.constant 0 : i32
    return %c0_i32, %c0_i32_0, %arg1 : i32, i32, i32
  }
  func.func @transform_2(%arg0: i32, %arg1: i32) -> (i32, i32) {
    %c0_i32 = arith.constant 0 : i32
    %c0_i32_0 = arith.constant 0 : i32
    return %c0_i32, %arg1 : i32, i32
  }
  func.func @transform_3(%arg0: i32, %arg1: i32) -> (i32, i32, i32) {
    %c0_i32 = arith.constant 0 : i32
    %c0_i32_0 = arith.constant 0 : i32
    return %arg0, %c0_i32, %arg1 : i32, i32, i32
  }
}

</mosaic_0001>

<bundles_post_ra>
// kernel: tpu_custom_call.1
= control target key start
LH: loop header
LB: loop body
LE: loop exit
PB: predicated region body
PF: predicated region fallthrough
CT: control target
= control target key end

     0   :  { %s2643_s12 = smov 0   ;;  %s2645_s13 = smov 0   ;;  %s3084_s0 = inlined_call_operand.vmem [shape: bf16[2,110,16], index: 0, kind: input, shape index: {}]   ;;  %s3085_s1 = inlined_call_operand.vmem [shape: bf16[9,16,32], index: 1, kind: input, shape index: {}]   ;;  %s3086_s2 = inlined_call_operand.vmem [shape: f32[1,32], index: 2, kind: input, shape index: {}]   ;;  %s3087_s3 = inlined_call_operand.vmem [shape: bf16[2,80,32], index: 3, kind: output, shape index: {}]  }
   0x1   :  { %s2647_s14 = smov 0  }
   0x2 LB: > { %s25_s15 = sadd.s32 1, %s2615_s13  ;;  %p2104_p0 = scmp.ge.s32.totalorder %s2619_s14, 1  ;;  %s2619_s14 = sphi %s2647_s14, %s13_s14   ;;  %s2615_s13 = sphi %s2645_s13, %s3089_s13   ;;  %s2611_s12 = sphi %s2643_s12, %s3088_s12  }
   0x3   : > { %p27_p1 = scmp.ge.s32.totalorder %s25_s15, 2  ;;  %p168_p2 = scmp.lt.s32.totalorder %s2619_s14, 3 }
   0x5   : > { %s3091_s15 = smov (%p27_p1, %s25_s15), 0  ;;  %p169_p3 = pnand %p2104_p0, %p168_p2 }
   0x6   : > { %p202_p4 = scmp.lt.s32.totalorder (!%p169_p3), %s2611_s12, 1 }
   0x7   : > { %172 = sbr.rel (%p169_p3) target bundleno = 410 (0x19a), region = 32 }
   0xc   : > { %v2535_v0 = vld [vmem:[%s3085_s1] sm:$0xff]   ;;  %v2621_v1 = vmov 0.0   ;;  %vm2622_vm0 = vmmov 0   ;;  %s3093_s12 = smov (!%p202_p4, %s2611_s12), 1  ;;  %v2538_v2 = vld [vmem:[%s3085_s1 + $0x8] sm:$0xff]   ;;  %vm266_vm1 = vcmask 130048  }
   0xd   : > { %2505 = vmatprep.subr.bf16.mxu1 %v2621_v1  ;;  %2307 = vmatprep.subr.bf16.mxu0 %v2621_v1  ;;  %s2507_s18 = smul.u32 56, %s3093_s12  ;;  %v2539_v3 = vld [vmem:[%s3085_s1 + $0x10] sm:$0xff]   ;;  %vm408_vm2 = vsmask.f32 7424  ;;  %v2545_v21 = vld [vmem:[%s3085_s1 + $0x18] sm:$0xff]   ;;  %vm619_vm3 = vcmask 1046528  }
   0xe   : > { %2506 = vmatpush3.bf16.msra.mxu1 %v2535_v0  ;;  %2308 = vmatpush3.bf16.msra.mxu0 %v2535_v0  ;;  %v2549_v29 = vld [vmem:[%s3085_s1 + $0x20] sm:$0xff]   ;;  %vm974_vm4 = vsmask.f32 6400  ;;  %vm1194_vm5 = vcmask 1045504   ;;  %vm1549_vm6 = vsmask.f32 5376 }
   0xf   : > { %2309 = vmatprep.mubr.msk.bf16.mxu0 %vm2622_vm0, %v2621_v1  ;;  %2321 = vmatprep.mubr.msk.bf16.mxu1 %vm2622_vm0, %v2621_v1  ;;  %s2681_s23 = scalar_lea.vmem %s3084_s0, %s2507_s18  ;;  %vm1769_vm7 = vcmask 1044480   ;;  %vm355_vm8 = vcmask 261120   ;;  %s2508_s17 = smul.u32 40, %s3093_s12  ;;  %vm1982_vm9 = vcmask 257024  }
  0x10   : > { %2329 = vmatprep.subr.bf16.mxu1 %v2621_v1  ;;  %2351 = vmatprep.subr.bf16.mxu0 %v2621_v1  ;;  %v2536_v4 = vld [vmem:[%s2681_s23] sm:$0xff]   ;;  %v2537_v5 = vld [vmem:[%s2681_s23 + $0x18] sm:$0xff]   ;;  %v2540_v6 = vld [vmem:[%s2681_s23 + $0x8] sm:$0xff]  }
  0x11   : > { %2310 = vmatmul.mubr.msk.bf16.vlgmr.msra.gmra.mxu0 %vm266_vm1, %v2536_v4  ;;  %2322 = vmatmul.mubr.msk.bf16.vlgmr.msra.gmra.mxu1 %vm266_vm1, %v2537_v5  ;;  %v2543_v7 = vld [vmem:[%s2681_s23] sm:$0xff]   ;;  %v2544_v8 = vld [vmem:[%s2681_s23 + $0x8] sm:$0xff]   ;;  %v2546_v16 = vld [vmem:[%s2681_s23 + $0x10] sm:$0xff]   ;;  %s3033_s12 = scalar_lea.vmem %s3087_s3, %s2508_s17 }
  0x12   : > { %2352 = vmatpush3.bf16.msra.mxu0 %v2539_v3  ;;  %2330 = vmatpush3.bf16.msra.mxu1 %v2538_v2  ;;  %v2541_v9 = vld [vmem:[%s2681_s23 + $0x20] sm:$0xff]   ;;  %v410_v10 = vshrl.u32 %v2543_v7, 16  ;;  %v412_v11 = vshll.u32 %v2543_v7, 16  ;;  %v417_v12 = vshll.u32 %v2544_v8, 16  ;;  %v2542_v17 = vld [vmem:[%s2681_s23 + $0x10] sm:$0xff]   ;;  %v2548_v19 = vld [vmem:[%s2681_s23 + $0x8] sm:$0xff]  }
  0x13   : > { %2313 = vmatprep.mubr.msk.bf16.mxu0 %vm2622_vm0, %v2621_v1  ;;  %2325 = vmatprep.mubr.msk.bf16.mxu1 %vm2622_vm0, %v2621_v1  ;;  %v2547_v18 = vld [vmem:[%s2681_s23] sm:$0xfe]   ;;  %v421_v22 = vshrl.u32 %v2544_v8, 16  ;;  %v425_v23 = vshll.u32 %v2546_v16, 16  ;;  %v621_v25 = vrot.slane %v2548_v19, 1  ;;  %v2550_v28 = vld [vmem:[%s2681_s23 + $0x18] sm:$0xff]  }
  0x14   : > { %2373 = vmatprep.subr.bf16.mxu1 %v2621_v1  ;;  %2395 = vmatprep.subr.bf16.mxu0 %v2621_v1  ;;  %v414_v13 = vrot.slane %v412_v11, 1  ;;  %v419_v15 = vrot.slane %v417_v12, 1  ;;  %v620_v24 = vrot.slane %v2547_v18, 1  ;;  %v2551_v31 = vld [vmem:[%s2681_s23 + $0x10] sm:$0xff]   ;;  %v429_v33 = vshrl.u32 %v2546_v16, 16  ;;  %v2552_v36 = vld [vmem:[%s2681_s23 + $0x20] sm:$0xff]  }
  0x15   : > { %v427_v27 = vrot.slane %v425_v23, 1  ;;  %v433_v34 = vshll.u32 %v2550_v28, 16  ;;  %v623_v35 = vrot.slane %v2551_v31, 1  ;;  %v2737_v39 = vld [vmem:[%s2681_s23 + $0x24] sm:$0xff]   ;;  %v437_v41 = vshrl.u32 %v2550_v28, 16  ;;  %v2553_v43 = vld [vmem:[%s2681_s23 + $0x18] sm:$0xff]  }
  0x16   : > { %v415_v14 = vor.u32 %v414_v13, %v410_v10  ;;  %v423_v26 = vor.u32 %v421_v22, %v419_v15  ;;  %v622_v30 = vsel %vm619_vm3, %v620_v24, %v621_v25  ;;  %v441_v42 = vshll.u32 %v2552_v36, 16  ;;  %v2568_v44 = vld [vmem:[%s2681_s23 + $0x2c] ss:$0 sps:$4 sm:$0x11]   ;;  %v2555_v53 = vld [vmem:[%s2681_s23 + $0x20] sm:$0xff]  }
  0x17   : > { %v431_v37 = vor.u32 %v429_v33, %v427_v27  ;;  %v435_v38 = vrot.slane %v433_v34, 1  ;;  %v624_v40 = vsel %vm619_vm3, %v621_v25, %v623_v35  ;;  %v804_v46 = vrot.slane %v2737_v39, 1  ;;  %v2554_v52 = vld [vmem:[%s2681_s23 + $0x28] ss:$0 sps:$4 sm:$0x11]   ;;  %v2562_v62 = vld [vmem:[%s2681_s23 + $0xc] sm:$0xff]  }
  0x18   : > { %v420_v20 = vsel %vm408_vm2, %v415_v14, %v419_v15  ;;  %v428_v32 = vsel %vm408_vm2, %v423_v26, %v427_v27  ;;  %v806_v47 = vrot.slane %v2568_v44, 1  ;;  %v625_v48 = vrot.slane %v2553_v43, 1  ;;  %v2556_v61 = vld [vmem:[%s2681_s23 + $0x28] ss:$0 sps:$4 sm:$0x11]   ;;  %v2558_v4 = vld [vmem:[%s2681_s23 + $0xc] sm:$0xff]  }
  0x19   : > { %2314 = vmatmul.mubr.msk.bf16.gmra.mxu0 %vm266_vm1, %v2540_v6  ;;  %2326 = vmatmul.mubr.msk.bf16.gmra.mxu1 %vm266_vm1, %v2541_v9  ;;  %v436_v45 = vsel %vm408_vm2, %v431_v37, %v435_v38  ;;  %v439_v50 = vor.u32 %v437_v41, %v435_v38  ;;  %v443_v51 = vrot.slane %v441_v42, 1  ;;  %v445_v56 = vshrl.u32 %v2552_v36, 16  ;;  %v2561_v0 = vld [vmem:[%s2681_s23 + $0x4] sm:$0xfe]   ;;  %v2565_v15 = vld [vmem:[%s2681_s23 + $0x14] sm:$0xff]  }
  0x1a   : > { %2317 = vmatprep.mubr.msk.bf16.mxu0 %vm2622_vm0, %v2621_v1  ;;  %2331 = vmatprep.mubr.msk.bf16.mxu1 %vm2622_vm0, %v2621_v1  ;;  %v2751_v49 = vsel %vm619_vm3, %v804_v46, %v806_v47  ;;  %v626_v54 = vsel %vm619_vm3, %v623_v35, %v625_v48  ;;  %v449_v57 = vshll.u32 %v2554_v52, 16  ;;  %v627_v58 = vrot.slane %v2555_v53, 1  ;;  %v2557_v3 = vld [vmem:[%s2681_s23 + $0x4] sm:$0xfe]   ;;  %v2563_v27 = vld [vmem:[%s3085_s1 + $0x30] sm:$0xff]  }
  0x1b   : > { %v444_v55 = vsel %vm408_vm2, %v439_v50, %v443_v51  ;;  %v447_v59 = vor.u32 %v445_v56, %v443_v51  ;;  %v984_v5 = vshrl.u32 %v2562_v62, 16  ;;  %v987_v6 = vshll.u32 %v2562_v62, 16  ;;  %v2559_v12 = vld [vmem:[%s3085_s1 + $0x28] sm:$0xff]  }
  0x1c   : > { %v451_v60 = vrot.slane %v449_v57, 1  ;;  %v628_v63 = vsel %vm619_vm3, %v625_v48, %v627_v58  ;;  %v629_v7 = vrot.slane %v2556_v61, 1  ;;  %v976_v8 = vshrl.u32 %v2561_v0, 16  ;;  %v2569_v41 = vld [vmem:[%s2681_s23 + $0x24] sm:$0xff]  }
  0x1d   : > { %v979_v9 = vshll.u32 %v2561_v0, 16  ;;  %v797_v10 = vrot.slane %v2557_v3, 1  ;;  %v798_v11 = vrot.slane %v2558_v4, 1  ;;  %v986_v13 = vrot.slane %v984_v5, 1  ;;  %v2576_v0 = vld [vmem:[%s2681_s23 + $0x10] sm:$0xff]  }
  0x1e   : > { %v452_v2 = vsel %vm408_vm2, %v447_v59, %v451_v60  ;;  %v989_v14 = vrot.slane %v987_v6, 2  ;;  %v630_v16 = vsel %vm619_vm3, %v627_v58, %v629_v7  ;;  %v993_v23 = vshrl.u32 %v2565_v15, 16  ;;  %v2570_v51 = vld [vmem:[%s2681_s23 + $0x2c] ss:$0 sps:$4 sm:$0x33]   ;;  %v2574_v3 = vld [vmem:[%s2681_s23 + $0x14] sm:$0xff]  }
  0x1f   : > { %v981_v18 = vrot.slane %v979_v9, 2  ;;  %v799_v19 = vsel %vm619_vm3, %v797_v10, %v798_v11  ;;  %v996_v24 = vshll.u32 %v2565_v15, 16  ;;  %v1011_v44 = vshrl.u32 %v2569_v41, 16  ;;  %v2572_v58 = vld [vmem:[%s2681_s23 + $0xc] sm:$0xff]   ;;  %v2579_v9 = vld [vmem:[%s2681_s23 + $0x18] sm:$0xff]   ;;  %v2581_v15 = vld [vmem:[%s2681_s23 + $0x20] sm:$0xff]  }
  0x20   : > { %v990_v22 = vor.u32 %v989_v14, %v986_v13  ;;  %v995_v28 = vrot.slane %v993_v23, 1  ;;  %v1196_v61 = vrot.slane %v2572_v58, 2  ;;  %v1373_v5 = vrot.slane %v2576_v0, 2 }
  0x21   : > { %2318 = vmatmul.mubr.msk.bf16.gmra.mxu0 %vm266_vm1, %v2542_v17  ;;  %2332 = vmatmul.mubr.msk.bf16.vlgmr.msra.gmra.mxu1 %vm266_vm1, %v420_v20  ;;  %v978_v17 = vrot.slane %v976_v8, 1  ;;  %v2560_v20 = vld [vmem:[%s2681_s23 + $0x14] sm:$0xff]   ;;  %v1013_v48 = vrot.slane %v1011_v44, 1  ;;  %v1198_v6 = vrot.slane %v2574_v3, 2  ;;  %v2577_v8 = vld [vmem:[%s3085_s1 + $0x40] sm:$0xff]  }
  0x22   : > { %2353 = vmatprep.mubr.msk.bf16.mxu0 %vm2622_vm0, %v2621_v1  ;;  %2374 = vmatpush3.bf16.msra.mxu1 %v2545_v21  ;;  %v800_v25 = vrot.slane %v2560_v20, 1 }
  0x23   : > { %2335 = vmatprep.mubr.msk.bf16.mxu1 %vm2622_vm0, %v2621_v1  ;;  %2417 = vmatprep.subr.bf16.mxu1 %v2621_v1  ;;  %v982_v21 = vor.u32 %v981_v18, %v978_v17  ;;  %v1199_v10 = vsel %vm1194_vm5, %v1196_v61, %v1198_v6  ;;  %v2580_v17 = vld [vmem:[%s2681_s23 + $0x24] sm:$0xff]   ;;  %v1377_v18 = vrot.slane %v2581_v15, 2 }
  0x24   : > { %v801_v31 = vsel %vm619_vm3, %v798_v11, %v800_v25  ;;  %v2578_v11 = vld [vmem:[%s2681_s23 + $0x1c] sm:$0xff]   ;;  %v2595_v15 = vld [vmem:[%s2681_s23 + $0x28] sm:$0xff]  }
  0x25   : > { %v991_v26 = vsel %vm974_vm4, %v982_v21, %v990_v22  ;;  %v1200_v13 = vrot.slane %v2578_v11, 2  ;;  %v2582_v21 = vld [vmem:[%s2681_s23 + $0x2c] ss:$0 sps:$4 sm:$0x33]  }
  0x29   : > { %2354 = vmatmul.mubr.msk.bf16.vlgmr.msra.gmra.mxu0 %vm266_vm1, %v622_v30  ;;  %2336 = vmatmul.mubr.msk.bf16.gmra.mxu1 %vm266_vm1, %v428_v32  ;;  %v2567_v30 = vld [vmem:[%s2681_s23 + $0x1c] sm:$0xff]  }
  0x2a   : > { %2396 = vmatpush3.bf16.msra.mxu0 %v2549_v29  ;;  %2339 = vmatprep.mubr.msk.bf16.mxu1 %vm2622_vm0, %v2621_v1  ;;  %v998_v29 = vrot.slane %v996_v24, 2  ;;  %v2564_v32 = vld [vmem:[%s2681_s23 + $0x1c] sm:$0xff]   ;;  %v1002_v34 = vshrl.u32 %v2567_v30, 16  ;;  %v1005_v35 = vshll.u32 %v2567_v30, 16  ;;  %v2585_v24 = vld [vmem:[%s2681_s23 + $0x8] sm:$0xfc]  }
  0x2b   : > { %2357 = vmatprep.mubr.msk.bf16.mxu0 %vm2622_vm0, %v2621_v1  ;;  %2439 = vmatprep.subr.bf16.mxu0 %v2621_v1  ;;  %v802_v36 = vrot.slane %v2564_v32, 1 }
  0x2c   : > { %v999_v33 = vor.u32 %v998_v29, %v995_v28  ;;  %v1004_v38 = vrot.slane %v1002_v34, 1  ;;  %v1551_v28 = vshrl.u32 %v2585_v24, 16  ;;  %v1554_v29 = vshll.u32 %v2585_v24, 16  ;;  %v2584_v34 = vld [vmem:[%s2681_s23 + $0x30] ss:$0 sps:$4 sm:$0x33]  }
  0x2d   : > { %v803_v42 = vsel %vm619_vm3, %v800_v25, %v802_v36  ;;  %v805_v52 = vsel %vm619_vm3, %v802_v36, %v804_v46  ;;  %v2571_v46 = vld [vmem:[%s2681_s23 + $0x4] sm:$0xfc]   ;;  %v2586_v25 = vld [vmem:[%s2681_s23 + $0x10] sm:$0xff]  }
  0x2e   : > { %v1000_v37 = vsel %vm974_vm4, %v990_v22, %v999_v33  ;;  %v1195_v60 = vrot.slane %v2571_v46, 2  ;;  %v2583_v22 = vld [vmem:[%s2681_s23 + $0x28] sm:$0xff]   ;;  %v1559_v30 = vshrl.u32 %v2586_v25, 16  ;;  %v1556_v36 = vrot.slane %v1554_v29, 3 }
  0x31   : > { %2358 = vmatmul.mubr.msk.bf16.gmra.mxu0 %vm266_vm1, %v624_v40  ;;  %2340 = vmatmul.mubr.msk.bf16.gmra.mxu1 %vm266_vm1, %v436_v45  ;;  %v1007_v40 = vrot.slane %v1005_v35, 2  ;;  %v1014_v45 = vshll.u32 %v2569_v41, 16  ;;  %v1553_v35 = vrot.slane %v1551_v28, 2  ;;  %v1381_v41 = vrot.slane %v2584_v34, 2 }
  0x32   : > { %2361 = vmatprep.mubr.msk.bf16.mxu0 %vm2622_vm0, %v2621_v1  ;;  %2343 = vmatprep.mubr.msk.bf16.mxu1 %vm2622_vm0, %v2621_v1 }
  0x33   : > { %v1008_v43 = vor.u32 %v1007_v40, %v1004_v38  ;;  %v1016_v50 = vrot.slane %v1014_v45, 2  ;;  %v2587_v40 = vld [vmem:[%s2681_s23 + $0x18] sm:$0xff]  }
  0x34   : > { %v1568_v44 = vshrl.u32 %v2587_v40, 16  ;;  %v1571_v45 = vshll.u32 %v2587_v40, 16 }
  0x35   : > { %v1009_v47 = vsel %vm974_vm4, %v999_v33, %v1008_v43  ;;  %v1017_v53 = vor.u32 %v1016_v50, %v1013_v48  ;;  %v2588_v48 = vld [vmem:[%s2681_s23 + $0x8] sm:$0xf8]   ;;  %v2589_v50 = vld [vmem:[%s2681_s23 + $0x10] sm:$0xff]  }
  0x37   : > { %v1018_v56 = vsel %vm974_vm4, %v1008_v43, %v1017_v53 }
  0x39   : > { %2362 = vmatmul.mubr.msk.bf16.gmra.mxu0 %vm266_vm1, %v626_v54  ;;  %2344 = vmatmul.mubr.msk.bf16.gmra.mxu1 %vm266_vm1, %v444_v55  ;;  %v1020_v54 = vshrl.u32 %v2570_v51, 16  ;;  %v1023_v55 = vshll.u32 %v2570_v51, 16 }
  0x3a   : > { %2365 = vmatprep.mubr.msk.bf16.mxu0 %vm2622_vm0, %v2621_v1  ;;  %2347 = vmatprep.mubr.msk.bf16.mxu1 %vm2622_vm0, %v2621_v1 }
  0x3b   : > { %v1022_v39 = vrot.slane %v1020_v54, 1  ;;  %v1025_v57 = vrot.slane %v1023_v55, 2  ;;  %v2590_v54 = vld [vmem:[%s2681_s23 + $0x20] sm:$0xff]   ;;  %v1770_v55 = vrot.slane %v2588_v48, 3 }
  0x3c   : > { %v1580_v46 = vshll.u32 %v2590_v54, 16 }
  0x3d   : > { %v1026_v59 = vor.u32 %v1025_v57, %v1022_v39  ;;  %v1577_v57 = vshrl.u32 %v2590_v54, 16 }
  0x3f   : > { %v1027_v62 = vsel %vm974_vm4, %v1017_v53, %v1026_v59  ;;  %v1573_v53 = vrot.slane %v1571_v45, 3  ;;  %v2591_v59 = vld [vmem:[%s2681_s23 + $0x18] sm:$0xff]  }
  0x40   : > { %v1773_v0 = vrot.slane %v2591_v59, 3 }
  0x41   : > { %2366 = vmatmul.mubr.msk.bf16.gmra.mxu0 %vm266_vm1, %v628_v63  ;;  %2348 = vmatmul.mubr.msk.bf16.gmra.mxu1 %vm266_vm1, %v452_v2  ;;  %v2575_v63 = vld [vmem:[%s2681_s23 + $0x8] sm:$0xfc]   ;;  %v1197_v2 = vsel %vm1194_vm5, %v1195_v60, %v1196_v61  ;;  %v1579_v61 = vrot.slane %v1577_v57, 2 }
  0x42   : > { %2369 = vmatprep.mubr.msk.bf16.mxu0 %vm2622_vm0, %v2621_v1  ;;  %2375 = vmatprep.mubr.msk.bf16.mxu1 %vm2622_vm0, %v2621_v1  ;;  %v1372_v4 = vrot.slane %v2575_v63, 2  ;;  %v2592_v63 = vld [vmem:[%s2681_s23 + $0x28] sm:$0xff]  }
  0x43   : > { %v1589_v3 = vshll.u32 %v2592_v63, 16 }
  0x44   : > { %v1374_v7 = vsel %vm1194_vm5, %v1372_v4, %v1373_v5 }
  0x49   : > { %2370 = vmatmul.mubr.msk.bf16.gmra.mxu0 %vm266_vm1, %v630_v16  ;;  %2376 = vmatmul.mubr.msk.bf16.vlgmr.msra.gmra.mxu1 %vm266_vm1, %v799_v19  ;;  %v1201_v16 = vsel %vm1194_vm5, %v1198_v6, %v1200_v13  ;;  %v1202_v19 = vrot.slane %v2580_v17, 2 }
  0x4a   : > { %2397 = vmatprep.mubr.msk.bf16.mxu0 %vm2622_vm0, %v2621_v1  ;;  %2418 = vmatpush3.bf16.msra.mxu1 %v2559_v12  ;;  %v1375_v12 = vrot.slane %v2579_v9, 2  ;;  %v2594_v9 = vld [vmem:[%s2681_s23 + $0x30] ss:$0 sps:$4 sm:$0x77]  }
  0x4b   : > { %2379 = vmatprep.mubr.msk.bf16.mxu1 %vm2622_vm0, %v2621_v1  ;;  %2461 = vmatprep.subr.bf16.mxu1 %v2621_v1  ;;  %v1203_v23 = vsel %vm1194_vm5, %v1200_v13, %v1202_v19  ;;  %v1598_v13 = vshll.u32 %v2594_v9, 16 }
  0x4c   : > { %v1376_v14 = vsel %vm1194_vm5, %v1373_v5, %v1375_v12  ;;  %v1378_v20 = vsel %vm1194_vm5, %v1375_v12, %v1377_v18  ;;  %v2593_v5 = vld [vmem:[%s2681_s23 + $0x20] sm:$0xff]   ;;  %v1595_v12 = vshrl.u32 %v2594_v9, 16 }
  0x4e   : > { %v1597_v17 = vrot.slane %v1595_v12, 2 }
  0x51   : > { %2398 = vmatmul.mubr.msk.bf16.vlgmr.msra.gmra.mxu0 %vm266_vm1, %v991_v26  ;;  %2380 = vmatmul.mubr.msk.bf16.gmra.mxu1 %vm266_vm1, %v801_v31  ;;  %v1204_v26 = vrot.slane %v2582_v21, 2  ;;  %v1562_v31 = vshll.u32 %v2586_v25, 16 }
  0x52   : > { %2440 = vmatpush3.bf16.msra.mxu0 %v2563_v27  ;;  %2383 = vmatprep.mubr.msk.bf16.mxu1 %vm2622_vm0, %v2621_v1  ;;  %v1379_v27 = vrot.slane %v2583_v22, 2  ;;  %v2596_v22 = vld [vmem:[%s2681_s23 + $0x30] ss:$0 sps:$4 sm:$0x77]  }
  0x53   : > { %2401 = vmatprep.mubr.msk.bf16.mxu0 %vm2622_vm0, %v2621_v1  ;;  %2483 = vmatprep.subr.bf16.mxu0 %v2621_v1  ;;  %v1205_v32 = vsel %vm1194_vm5, %v1202_v19, %v1204_v26  ;;  %v1564_v38 = vrot.slane %v1562_v31, 3  ;;  %v1777_v19 = vrot.slane %v2595_v15, 3  ;;  %v1779_v24 = vrot.slane %v2596_v22, 3 }
  0x54   : > { %v1380_v33 = vsel %vm1194_vm5, %v1377_v18, %v1379_v27  ;;  %v1600_v18 = vrot.slane %v1598_v13, 3 }
  0x55   : > { %v1780_v25 = vsel %vm1769_vm7, %v1777_v19, %v1779_v24 }
  0x59   : > { %2402 = vmatmul.mubr.msk.bf16.gmra.mxu0 %vm266_vm1, %v1000_v37  ;;  %2384 = vmatmul.mubr.msk.bf16.gmra.mxu1 %vm266_vm1, %v803_v42  ;;  %v1561_v37 = vrot.slane %v1559_v30, 2  ;;  %v1557_v42 = vor.u32 %v1556_v36, %v1553_v35 }
  0x5a   : > { %2405 = vmatprep.mubr.msk.bf16.mxu0 %vm2622_vm0, %v2621_v1  ;;  %2387 = vmatprep.mubr.msk.bf16.mxu1 %vm2622_vm0, %v2621_v1 }
  0x5b   : > { %v1565_v43 = vor.u32 %v1564_v38, %v1561_v37 }
  0x5d   : > { %v1566_v51 = vsel %vm1549_vm6, %v1557_v42, %v1565_v43 }
  0x61   : > { %2406 = vmatmul.mubr.msk.bf16.gmra.mxu0 %vm266_vm1, %v1009_v47  ;;  %2388 = vmatmul.mubr.msk.bf16.gmra.mxu1 %vm266_vm1, %v805_v52  ;;  %v1382_v47 = vsel %vm1194_vm5, %v1379_v27, %v1381_v41  ;;  %v1570_v52 = vrot.slane %v1568_v44, 2 }
  0x62   : > { %2409 = vmatprep.mubr.msk.bf16.mxu0 %vm2622_vm0, %v2621_v1  ;;  %2391 = vmatprep.mubr.msk.bf16.mxu1 %vm2622_vm0, %v2621_v1 }
  0x63   : > { %v1574_v39 = vor.u32 %v1573_v53, %v1570_v52 }
  0x65   : > { %v1575_v60 = vsel %vm1549_vm6, %v1565_v43, %v1574_v39 }
  0x69   : > { %2410 = vmatmul.mubr.msk.bf16.gmra.mxu0 %vm266_vm1, %v1018_v56  ;;  %2392 = vmatmul.mubr.msk.bf16.gmra.mxu1 %vm266_vm1, %v2751_v49  ;;  %v2573_v49 = vld [vmem:[%s3085_s1 + $0x38] sm:$0xff]   ;;  %v1771_v56 = vrot.slane %v2589_v50, 3 }
  0x6a   : > { %2413 = vmatprep.mubr.msk.bf16.mxu0 %vm2622_vm0, %v2621_v1  ;;  %2419 = vmatprep.mubr.msk.bf16.mxu1 %vm2622_vm0, %v2621_v1 }
  0x6b   : > { %v1772_v58 = vsel %vm1769_vm7, %v1770_v55, %v1771_v56  ;;  %v1774_v4 = vsel %vm1769_vm7, %v1771_v56, %v1773_v0 }
  0x71   : > { %2414 = vmatmul.mubr.msk.bf16.gmra.mxu0 %vm266_vm1, %v1027_v62  ;;  %2420 = vmatmul.mubr.msk.bf16.vlgmr.msra.gmra.mxu1 %vm266_vm1, %v1197_v2  ;;  %v1582_v62 = vrot.slane %v1580_v46, 3 }
  0x72   : > { %2441 = vmatprep.mubr.msk.bf16.mxu0 %vm2622_vm0, %v2621_v1  ;;  %2462 = vmatpush3.bf16.msra.mxu1 %v2573_v49  ;;  %v1586_v49 = vshrl.u32 %v2592_v63, 16 }
  0x73   : > { %2423 = vmatprep.mubr.msk.bf16.mxu1 %vm2622_vm0, %v2621_v1  ;;  %v1583_v2 = vor.u32 %v1582_v62, %v1579_v61 }
  0x75   : > { %v1584_v6 = vsel %vm1549_vm6, %v1574_v39, %v1583_v2 }
  0x79   : > { %2442 = vmatmul.mubr.msk.bf16.vlgmr.msra.gmra.mxu0 %vm266_vm1, %v1374_v7  ;;  %2424 = vmatmul.mubr.msk.bf16.gmra.mxu1 %vm266_vm1, %v1199_v10  ;;  %v1588_v7 = vrot.slane %v1586_v49, 2  ;;  %v1775_v10 = vrot.slane %v2593_v5, 3 }
  0x7a   : > { %2484 = vmatpush3.bf16.msra.mxu0 %v2577_v8  ;;  %2427 = vmatprep.mubr.msk.bf16.mxu1 %vm2622_vm0, %v2621_v1  ;;  %v1591_v8 = vrot.slane %v1589_v3, 3 }
  0x7b   : > { %2445 = vmatprep.mubr.msk.bf16.mxu0 %vm2622_vm0, %v2621_v1  ;;  %v1778_v21 = vsel %vm1769_vm7, %v1775_v10, %v1777_v19 }
  0x7c   : > { %v1592_v11 = vor.u32 %v1591_v8, %v1588_v7 }
  0x81   : > { %2446 = vmatmul.mubr.msk.bf16.gmra.mxu0 %vm266_vm1, %v1376_v14  ;;  %2428 = vmatmul.mubr.msk.bf16.gmra.mxu1 %vm266_vm1, %v1201_v16  ;;  %v1776_v14 = vsel %vm1769_vm7, %v1773_v0, %v1775_v10  ;;  %v1593_v16 = vsel %vm1549_vm6, %v1583_v2, %v1592_v11 }
  0x82   : > { %2449 = vmatprep.mubr.msk.bf16.mxu0 %vm2622_vm0, %v2621_v1  ;;  %2431 = vmatprep.mubr.msk.bf16.mxu1 %vm2622_vm0, %v2621_v1 }
  0x89   : > { %2450 = vmatmul.mubr.msk.bf16.gmra.mxu0 %vm266_vm1, %v1378_v20  ;;  %2432 = vmatmul.mubr.msk.bf16.gmra.mxu1 %vm266_vm1, %v1203_v23  ;;  %v1601_v20 = vor.u32 %v1600_v18, %v1597_v17 }
  0x8a   : > { %2453 = vmatprep.mubr.msk.bf16.mxu0 %vm2622_vm0, %v2621_v1  ;;  %2435 = vmatprep.mubr.msk.bf16.mxu1 %vm2622_vm0, %v2621_v1 }
  0x8b   : > { %v1602_v23 = vsel %vm1549_vm6, %v1592_v11, %v1601_v20 }
  0x91   : > { %2454 = vmatmul.mubr.msk.bf16.gmra.mxu0 %vm266_vm1, %v1380_v33  ;;  %2436 = vmatmul.mubr.msk.bf16.gmra.mxu1 %vm266_vm1, %v1205_v32 }
  0x92   : > { %2457 = vmatprep.mubr.msk.bf16.mxu0 %vm2622_vm0, %v2621_v1  ;;  %2463 = vmatprep.mubr.msk.bf16.mxu1 %vm2622_vm0, %v2621_v1 }
  0x99   : > { %2458 = vmatmul.mubr.msk.bf16.gmra.mxu0 %vm266_vm1, %v1382_v47  ;;  %2464 = vmatmul.mubr.msk.bf16.vlgmr.msra.gmra.mxu1 %vm266_vm1, %v1566_v51 }
  0x9a   : > { %2485 = vmatprep.mubr.msk.bf16.mxu0 %vm2622_vm0, %v2621_v1  ;;  %2467 = vmatprep.mubr.msk.bf16.mxu1 %vm2622_vm0, %v2621_v1 }
  0xa1   : > { %2486 = vmatmul.mubr.msk.bf16.vlgmr.msra.gmra.mxu0 %vm266_vm1, %v1772_v58  ;;  %2468 = vmatmul.mubr.msk.bf16.gmra.mxu1 %vm266_vm1, %v1575_v60 }
  0xa2   : > { %2489 = vmatprep.mubr.msk.bf16.mxu0 %vm2622_vm0, %v2621_v1  ;;  %2471 = vmatprep.mubr.msk.bf16.mxu1 %vm2622_vm0, %v2621_v1 }
  0xa9   : > { %2490 = vmatmul.mubr.msk.bf16.gmra.mxu0 %vm266_vm1, %v1774_v4  ;;  %2472 = vmatmul.mubr.msk.bf16.gmra.mxu1 %vm266_vm1, %v1584_v6 }
  0xaa   : > { %2493 = vmatprep.mubr.msk.bf16.mxu0 %vm2622_vm0, %v2621_v1  ;;  %2475 = vmatprep.mubr.msk.bf16.mxu1 %vm2622_vm0, %v2621_v1 }
  0xb1   : > { %2494 = vmatmul.mubr.msk.bf16.gmra.mxu0 %vm266_vm1, %v1776_v14  ;;  %2476 = vmatmul.mubr.msk.bf16.gmra.mxu1 %vm266_vm1, %v1593_v16 }
  0xb2   : > { %2497 = vmatprep.mubr.msk.bf16.mxu0 %vm2622_vm0, %v2621_v1  ;;  %2479 = vmatprep.mubr.msk.bf16.mxu1 %vm2622_vm0, %v2621_v1 }
  0xb9   : > { %2498 = vmatmul.mubr.msk.bf16.gmra.mxu0 %vm266_vm1, %v1778_v21  ;;  %2480 = vmatmul.mubr.msk.bf16.gmra.mxu1 %vm266_vm1, %v1602_v23 }
  0xba   : > { %2501 = vmatprep.mubr.msk.bf16.mxu0 %vm2622_vm0, %v2621_v1 }
  0xc1   : > { %2502 = vmatmul.mubr.msk.bf16.gmra.mxu0 %vm266_vm1, %v1780_v25 }
  0xd1   : > { %v316_v26 = vpop.f32.mrf.mxu0  ;;  %v340_v27 = vpop.f32.mrf.mxu1 }
  0xd2   : > { %356 = vst.msk [vmem:[#allocation2] sm:$0xff] %vm355_vm8, %v316_v26  ;;  %362 = vst.msk [vmem:[#allocation2 + $0x30] sm:$0xff] %vm355_vm8, %v340_v27 }
  0xd3   : > { %v2311_v28 = vpop.f32.mrf.mxu0  ;;  %v2323_v29 = vpop.f32.mrf.mxu1 }
  0xd5   : > { %v319_v30 = vpop.f32.mrf.mxu0  ;;  %v343_v31 = vpop.f32.mrf.mxu1 }
  0xd6   : > { %357 = vst.msk [vmem:[#allocation2 + $0x8] sm:$0xff] %vm355_vm8, %v319_v30  ;;  %363 = vst.msk [vmem:[#allocation2 + $0x38] sm:$0xff] %vm355_vm8, %v343_v31 }
  0xd7   : > { %v2312_v1 = vpop.f32.mrf.mxu0  ;;  %v2324_v32 = vpop.f32.mrf.mxu1 }
  0xd9   : > { %v324_v33 = vpop.f32.mrf.mxu0  ;;  %v348_v34 = vpop.f32.mrf.mxu1  ;;  %v547_v44 = vld [vmem:[#allocation2] sm:$0xff]  ;;  %v553_v24 = vld [vmem:[#allocation2 + $0x30] sm:$0xff] }
  0xda   : > { %358 = vst.msk [vmem:[#allocation2 + $0x10] sm:$0xff] %vm355_vm8, %v324_v33  ;;  %364 = vst.msk [vmem:[#allocation2 + $0x40] sm:$0xff] %vm355_vm8, %v348_v34 }
  0xdb   : > { %v2315_v35 = vpop.f32.mrf.mxu0  ;;  %v2327_v36 = vpop.f32.mrf.mxu1 }
  0xdd   : > { %v327_v37 = vpop.f32.mrf.mxu0  ;;  %v351_v38 = vpop.f32.mrf.mxu1  ;;  %v548_v52 = vld [vmem:[#allocation2 + $0x8] sm:$0xff]  ;;  %v554_v1 = vld [vmem:[#allocation2 + $0x38] sm:$0xff] }
  0xde   : > { %359 = vst.msk [vmem:[#allocation2 + $0x18] sm:$0xff] %vm355_vm8, %v327_v37  ;;  %365 = vst.msk [vmem:[#allocation2 + $0x48] sm:$0xff] %vm355_vm8, %v351_v38 }
  0xdf   : > { %v2316_v40 = vpop.f32.mrf.mxu0  ;;  %v2328_v41 = vpop.f32.mrf.mxu1 }
  0xe1   : > { %v332_v42 = vpop.f32.mrf.mxu0  ;;  %v508_v43 = vpop.f32.mrf.mxu1  ;;  %v549_v57 = vld [vmem:[#allocation2 + $0x10] sm:$0xff]  ;;  %v555_v40 = vld [vmem:[#allocation2 + $0x40] sm:$0xff] }
  0xe2   : > { %360 = vst.msk [vmem:[#allocation2 + $0x20] sm:$0xff] %vm355_vm8, %v332_v42  ;;  %v557_v45 = vadd.f32 %v547_v44, %v508_v43 }
  0xe3   : > { %v2319_v47 = vpop.f32.mrf.mxu0  ;;  %v2333_v48 = vpop.f32.mrf.mxu1 }
  0xe4   : > { %567 = vst.msk [vmem:[#allocation2] sm:$0xff] %vm355_vm8, %v557_v45 }
  0xe5   : > { %v335_v50 = vpop.f32.mrf.mxu0  ;;  %v511_v51 = vpop.f32.mrf.mxu1  ;;  %v550_v0 = vld [vmem:[#allocation2 + $0x18] sm:$0xff] }
  0xe6   : > { %361 = vst.msk [vmem:[#allocation2 + $0x28] sm:$0xff] %vm355_vm8, %v335_v50  ;;  %v558_v53 = vadd.f32 %v548_v52, %v511_v51  ;;  %v556_v50 = vld [vmem:[#allocation2 + $0x48] sm:$0xff] }
  0xe7   : > { %v2320_v54 = vpop.f32.mrf.mxu0  ;;  %v2334_v55 = vpop.f32.mrf.mxu1 }
  0xe8   : > { %568 = vst.msk [vmem:[#allocation2 + $0x8] sm:$0xff] %vm355_vm8, %v558_v53 }
  0xe9   : > { %v686_v56 = vpop.f32.mrf.mxu0  ;;  %v516_v39 = vpop.f32.mrf.mxu1  ;;  %v551_v8 = vld [vmem:[#allocation2 + $0x20] sm:$0xff] }
  0xea   : > { %v559_v46 = vadd.f32 %v549_v57, %v516_v39 }
  0xeb   : > { %v2355_v58 = vpop.f32.mrf.mxu0  ;;  %v725_v59 = vld [vmem:[#allocation2] sm:$0xff]  ;;  %v2337_v60 = vpop.f32.mrf.mxu1 }
  0xec   : > { %569 = vst.msk [vmem:[#allocation2 + $0x10] sm:$0xff] %vm355_vm8, %v559_v46  ;;  %v735_v61 = vadd.f32 %v725_v59, %v686_v56 }
  0xed   : > { %v689_v62 = vpop.f32.mrf.mxu0  ;;  %v519_v63 = vpop.f32.mrf.mxu1  ;;  %v552_v16 = vld [vmem:[#allocation2 + $0x28] sm:$0xff] }
  0xee   : > { %745 = vst.msk [vmem:[#allocation2] sm:$0xff] %vm355_vm8, %v735_v61  ;;  %v560_v2 = vadd.f32 %v550_v0, %v519_v63 }
  0xef   : > { %v2356_v49 = vpop.f32.mrf.mxu0  ;;  %v726_v3 = vld [vmem:[#allocation2 + $0x8] sm:$0xff]  ;;  %v2338_v4 = vpop.f32.mrf.mxu1 }
  0xf0   : > { %570 = vst.msk [vmem:[#allocation2 + $0x18] sm:$0xff] %vm355_vm8, %v560_v2  ;;  %v736_v5 = vadd.f32 %v726_v3, %v689_v62 }
  0xf1   : > { %v694_v6 = vpop.f32.mrf.mxu0  ;;  %v524_v7 = vpop.f32.mrf.mxu1 }
  0xf2   : > { %746 = vst.msk [vmem:[#allocation2 + $0x8] sm:$0xff] %vm355_vm8, %v736_v5  ;;  %v561_v9 = vadd.f32 %v551_v8, %v524_v7 }
  0xf3   : > { %v2359_v10 = vpop.f32.mrf.mxu0  ;;  %v727_v11 = vld [vmem:[#allocation2 + $0x10] sm:$0xff]  ;;  %v2341_v12 = vpop.f32.mrf.mxu1 }
  0xf4   : > { %571 = vst.msk [vmem:[#allocation2 + $0x20] sm:$0xff] %vm355_vm8, %v561_v9  ;;  %v737_v13 = vadd.f32 %v727_v11, %v694_v6 }
  0xf5   : > { %v697_v14 = vpop.f32.mrf.mxu0  ;;  %v527_v15 = vpop.f32.mrf.mxu1  ;;  %v902_v57 = vld [vmem:[#allocation2] sm:$0xff] }
  0xf6   : > { %747 = vst.msk [vmem:[#allocation2 + $0x10] sm:$0xff] %vm355_vm8, %v737_v13  ;;  %v562_v17 = vadd.f32 %v552_v16, %v527_v15 }
  0xf7   : > { %v2360_v18 = vpop.f32.mrf.mxu0  ;;  %v728_v19 = vld [vmem:[#allocation2 + $0x18] sm:$0xff]  ;;  %v2342_v20 = vpop.f32.mrf.mxu1 }
  0xf8   : > { %572 = vst.msk [vmem:[#allocation2 + $0x28] sm:$0xff] %vm355_vm8, %v562_v17  ;;  %v738_v21 = vadd.f32 %v728_v19, %v697_v14 }
  0xf9   : > { %v702_v22 = vpop.f32.mrf.mxu0  ;;  %v532_v23 = vpop.f32.mrf.mxu1  ;;  %v903_v0 = vld [vmem:[#allocation2 + $0x8] sm:$0xff] }
  0xfa   : > { %748 = vst.msk [vmem:[#allocation2 + $0x18] sm:$0xff] %vm355_vm8, %v738_v21  ;;  %v563_v25 = vadd.f32 %v553_v24, %v532_v23 }
  0xfb   : > { %v2363_v26 = vpop.f32.mrf.mxu0  ;;  %v729_v27 = vld [vmem:[#allocation2 + $0x20] sm:$0xff]  ;;  %v2345_v28 = vpop.f32.mrf.mxu1 }
  0xfc   : > { %573 = vst.msk [vmem:[#allocation2 + $0x30] sm:$0xff] %vm355_vm8, %v563_v25  ;;  %v739_v29 = vadd.f32 %v729_v27, %v702_v22 }
  0xfd   : > { %v705_v30 = vpop.f32.mrf.mxu0  ;;  %v535_v31 = vpop.f32.mrf.mxu1  ;;  %v904_v8 = vld [vmem:[#allocation2 + $0x10] sm:$0xff] }
  0xfe   : > { %749 = vst.msk [vmem:[#allocation2 + $0x20] sm:$0xff] %vm355_vm8, %v739_v29  ;;  %v564_v32 = vadd.f32 %v554_v1, %v535_v31 }
  0xff   : > { %v2364_v33 = vpop.f32.mrf.mxu0  ;;  %v730_v34 = vld [vmem:[#allocation2 + $0x28] sm:$0xff]  ;;  %v2346_v35 = vpop.f32.mrf.mxu1 }
 0x100   : > { %574 = vst.msk [vmem:[#allocation2 + $0x38] sm:$0xff] %vm355_vm8, %v564_v32  ;;  %v740_v36 = vadd.f32 %v730_v34, %v705_v30 }
 0x101   : > { %v710_v37 = vpop.f32.mrf.mxu0  ;;  %v540_v38 = vpop.f32.mrf.mxu1  ;;  %v905_v16 = vld [vmem:[#allocation2 + $0x18] sm:$0xff] }
 0x102   : > { %750 = vst.msk [vmem:[#allocation2 + $0x28] sm:$0xff] %vm355_vm8, %v740_v36  ;;  %v565_v41 = vadd.f32 %v555_v40, %v540_v38 }
 0x103   : > { %v2367_v42 = vpop.f32.mrf.mxu0  ;;  %v731_v43 = vld [vmem:[#allocation2 + $0x30] sm:$0xff]  ;;  %v2349_v44 = vpop.f32.mrf.mxu1 }
 0x104   : > { %575 = vst.msk [vmem:[#allocation2 + $0x40] sm:$0xff] %vm355_vm8, %v565_v41  ;;  %v741_v45 = vadd.f32 %v731_v43, %v710_v37 }
 0x105   : > { %v713_v47 = vpop.f32.mrf.mxu0  ;;  %v543_v48 = vpop.f32.mrf.mxu1  ;;  %v906_v24 = vld [vmem:[#allocation2 + $0x20] sm:$0xff] }
 0x106   : > { %751 = vst.msk [vmem:[#allocation2 + $0x30] sm:$0xff] %vm355_vm8, %v741_v45  ;;  %v566_v51 = vadd.f32 %v556_v50, %v543_v48 }
 0x107   : > { %v2368_v52 = vpop.f32.mrf.mxu0  ;;  %v732_v53 = vld [vmem:[#allocation2 + $0x38] sm:$0xff]  ;;  %v2350_v54 = vpop.f32.mrf.mxu1 }
 0x108   : > { %576 = vst.msk [vmem:[#allocation2 + $0x48] sm:$0xff] %vm355_vm8, %v566_v51  ;;  %v742_v55 = vadd.f32 %v732_v53, %v713_v47 }
 0x109   : > { %v718_v56 = vpop.f32.mrf.mxu0  ;;  %v863_v39 = vpop.f32.mrf.mxu1  ;;  %v907_v1 = vld [vmem:[#allocation2 + $0x28] sm:$0xff] }
 0x10a   : > { %752 = vst.msk [vmem:[#allocation2 + $0x38] sm:$0xff] %vm355_vm8, %v742_v55  ;;  %v912_v46 = vadd.f32 %v902_v57, %v863_v39 }
 0x10b   : > { %v2371_v58 = vpop.f32.mrf.mxu0  ;;  %v733_v59 = vld [vmem:[#allocation2 + $0x40] sm:$0xff]  ;;  %v2377_v60 = vpop.f32.mrf.mxu1 }
 0x10c   : > { %v743_v61 = vadd.f32 %v733_v59, %v718_v56  ;;  %922 = vst.msk [vmem:[#allocation2] sm:$0xff] %vm355_vm8, %v912_v46 }
 0x10d   : > { %v721_v62 = vpop.f32.mrf.mxu0  ;;  %v866_v63 = vpop.f32.mrf.mxu1  ;;  %v908_v40 = vld [vmem:[#allocation2 + $0x30] sm:$0xff] }
 0x10e   : > { %753 = vst.msk [vmem:[#allocation2 + $0x40] sm:$0xff] %vm355_vm8, %v743_v61  ;;  %v913_v2 = vadd.f32 %v903_v0, %v866_v63 }
 0x10f   : > { %v2372_v49 = vpop.f32.mrf.mxu0  ;;  %v734_v3 = vld [vmem:[#allocation2 + $0x48] sm:$0xff]  ;;  %v2378_v4 = vpop.f32.mrf.mxu1 }
 0x110   : > { %v744_v5 = vadd.f32 %v734_v3, %v721_v62  ;;  %923 = vst.msk [vmem:[#allocation2 + $0x8] sm:$0xff] %vm355_vm8, %v913_v2 }
 0x111   : > { %v1083_v6 = vpop.f32.mrf.mxu0  ;;  %v871_v7 = vpop.f32.mrf.mxu1  ;;  %v909_v50 = vld [vmem:[#allocation2 + $0x38] sm:$0xff] }
 0x112   : > { %754 = vst.msk [vmem:[#allocation2 + $0x48] sm:$0xff] %vm355_vm8, %v744_v5  ;;  %v914_v9 = vadd.f32 %v904_v8, %v871_v7 }
 0x113   : > { %v2399_v10 = vpop.f32.mrf.mxu0  ;;  %v1122_v11 = vld [vmem:[#allocation2] sm:$0xff]  ;;  %v2381_v12 = vpop.f32.mrf.mxu1 }
 0x114   : > { %924 = vst.msk [vmem:[#allocation2 + $0x10] sm:$0xff] %vm355_vm8, %v914_v9  ;;  %v1132_v13 = vadd.f32 %v1122_v11, %v1083_v6 }
 0x115   : > { %v1086_v14 = vpop.f32.mrf.mxu0  ;;  %v874_v15 = vpop.f32.mrf.mxu1  ;;  %v910_v57 = vld [vmem:[#allocation2 + $0x40] sm:$0xff] }
 0x116   : > { %1142 = vst.msk [vmem:[#allocation2] sm:$0xff] %vm355_vm8, %v1132_v13  ;;  %v915_v17 = vadd.f32 %v905_v16, %v874_v15 }
 0x117   : > { %v2400_v18 = vpop.f32.mrf.mxu0  ;;  %v1123_v19 = vld [vmem:[#allocation2 + $0x8] sm:$0xff]  ;;  %v2382_v20 = vpop.f32.mrf.mxu1 }
 0x118   : > { %925 = vst.msk [vmem:[#allocation2 + $0x18] sm:$0xff] %vm355_vm8, %v915_v17  ;;  %v1133_v21 = vadd.f32 %v1123_v19, %v1086_v14 }
 0x119   : > { %v1091_v22 = vpop.f32.mrf.mxu0  ;;  %v879_v23 = vpop.f32.mrf.mxu1  ;;  %v911_v0 = vld [vmem:[#allocation2 + $0x48] sm:$0xff] }
 0x11a   : > { %1143 = vst.msk [vmem:[#allocation2 + $0x8] sm:$0xff] %vm355_vm8, %v1133_v21  ;;  %v916_v25 = vadd.f32 %v906_v24, %v879_v23 }
 0x11b   : > { %v2403_v26 = vpop.f32.mrf.mxu0  ;;  %v1124_v27 = vld [vmem:[#allocation2 + $0x10] sm:$0xff]  ;;  %v2385_v28 = vpop.f32.mrf.mxu1 }
 0x11c   : > { %926 = vst.msk [vmem:[#allocation2 + $0x20] sm:$0xff] %vm355_vm8, %v916_v25  ;;  %v1134_v29 = vadd.f32 %v1124_v27, %v1091_v22 }
 0x11d   : > { %v1094_v30 = vpop.f32.mrf.mxu0  ;;  %v882_v31 = vpop.f32.mrf.mxu1  ;;  %v1300_v8 = vld [vmem:[#allocation2] sm:$0xff] }
 0x11e   : > { %1144 = vst.msk [vmem:[#allocation2 + $0x10] sm:$0xff] %vm355_vm8, %v1134_v29  ;;  %v917_v32 = vadd.f32 %v907_v1, %v882_v31 }
 0x11f   : > { %v2404_v33 = vpop.f32.mrf.mxu0  ;;  %v1125_v34 = vld [vmem:[#allocation2 + $0x18] sm:$0xff]  ;;  %v2386_v35 = vpop.f32.mrf.mxu1 }
 0x120   : > { %927 = vst.msk [vmem:[#allocation2 + $0x28] sm:$0xff] %vm355_vm8, %v917_v32  ;;  %v1135_v36 = vadd.f32 %v1125_v34, %v1094_v30 }
 0x121   : > { %v1099_v37 = vpop.f32.mrf.mxu0  ;;  %v887_v38 = vpop.f32.mrf.mxu1  ;;  %v1301_v16 = vld [vmem:[#allocation2 + $0x8] sm:$0xff] }
 0x122   : > { %1145 = vst.msk [vmem:[#allocation2 + $0x18] sm:$0xff] %vm355_vm8, %v1135_v36  ;;  %v918_v41 = vadd.f32 %v908_v40, %v887_v38 }
 0x123   : > { %v2407_v42 = vpop.f32.mrf.mxu0  ;;  %v1126_v43 = vld [vmem:[#allocation2 + $0x20] sm:$0xff]  ;;  %v2389_v44 = vpop.f32.mrf.mxu1 }
 0x124   : > { %928 = vst.msk [vmem:[#allocation2 + $0x30] sm:$0xff] %vm355_vm8, %v918_v41  ;;  %v1136_v45 = vadd.f32 %v1126_v43, %v1099_v37 }
 0x125   : > { %v1102_v47 = vpop.f32.mrf.mxu0  ;;  %v890_v48 = vpop.f32.mrf.mxu1  ;;  %v1302_v24 = vld [vmem:[#allocation2 + $0x10] sm:$0xff] }
 0x126   : > { %1146 = vst.msk [vmem:[#allocation2 + $0x20] sm:$0xff] %vm355_vm8, %v1136_v45  ;;  %v919_v51 = vadd.f32 %v909_v50, %v890_v48 }
 0x127   : > { %v2408_v52 = vpop.f32.mrf.mxu0  ;;  %v1127_v53 = vld [vmem:[#allocation2 + $0x28] sm:$0xff]  ;;  %v2390_v54 = vpop.f32.mrf.mxu1 }
 0x128   : > { %929 = vst.msk [vmem:[#allocation2 + $0x38] sm:$0xff] %vm355_vm8, %v919_v51  ;;  %v1137_v55 = vadd.f32 %v1127_v53, %v1102_v47 }
 0x129   : > { %v1107_v56 = vpop.f32.mrf.mxu0  ;;  %v895_v39 = vpop.f32.mrf.mxu1  ;;  %v1303_v1 = vld [vmem:[#allocation2 + $0x18] sm:$0xff] }
 0x12a   : > { %1147 = vst.msk [vmem:[#allocation2 + $0x28] sm:$0xff] %vm355_vm8, %v1137_v55  ;;  %v920_v46 = vadd.f32 %v910_v57, %v895_v39 }
 0x12b   : > { %v2411_v58 = vpop.f32.mrf.mxu0  ;;  %v1128_v59 = vld [vmem:[#allocation2 + $0x30] sm:$0xff]  ;;  %v2393_v60 = vpop.f32.mrf.mxu1 }
 0x12c   : > { %930 = vst.msk [vmem:[#allocation2 + $0x40] sm:$0xff] %vm355_vm8, %v920_v46  ;;  %v1138_v61 = vadd.f32 %v1128_v59, %v1107_v56 }
 0x12d   : > { %v1110_v62 = vpop.f32.mrf.mxu0  ;;  %v898_v63 = vpop.f32.mrf.mxu1  ;;  %v1304_v40 = vld [vmem:[#allocation2 + $0x20] sm:$0xff] }
 0x12e   : > { %1148 = vst.msk [vmem:[#allocation2 + $0x30] sm:$0xff] %vm355_vm8, %v1138_v61  ;;  %v921_v2 = vadd.f32 %v911_v0, %v898_v63 }
 0x12f   : > { %v2412_v49 = vpop.f32.mrf.mxu0  ;;  %v1129_v3 = vld [vmem:[#allocation2 + $0x38] sm:$0xff]  ;;  %v2394_v4 = vpop.f32.mrf.mxu1 }
 0x130   : > { %931 = vst.msk [vmem:[#allocation2 + $0x48] sm:$0xff] %vm355_vm8, %v921_v2  ;;  %v1139_v5 = vadd.f32 %v1129_v3, %v1110_v62 }
 0x131   : > { %v1115_v6 = vpop.f32.mrf.mxu0  ;;  %v1261_v7 = vpop.f32.mrf.mxu1  ;;  %v1305_v50 = vld [vmem:[#allocation2 + $0x28] sm:$0xff] }
 0x132   : > { %1149 = vst.msk [vmem:[#allocation2 + $0x38] sm:$0xff] %vm355_vm8, %v1139_v5  ;;  %v1310_v9 = vadd.f32 %v1300_v8, %v1261_v7 }
 0x133   : > { %v2415_v10 = vpop.f32.mrf.mxu0  ;;  %v1130_v11 = vld [vmem:[#allocation2 + $0x40] sm:$0xff]  ;;  %v2421_v12 = vpop.f32.mrf.mxu1 }
 0x134   : > { %v1140_v13 = vadd.f32 %v1130_v11, %v1115_v6  ;;  %1320 = vst.msk [vmem:[#allocation2] sm:$0xff] %vm355_vm8, %v1310_v9 }
 0x135   : > { %v1118_v14 = vpop.f32.mrf.mxu0  ;;  %v1264_v15 = vpop.f32.mrf.mxu1  ;;  %v1306_v57 = vld [vmem:[#allocation2 + $0x30] sm:$0xff] }
 0x136   : > { %1150 = vst.msk [vmem:[#allocation2 + $0x40] sm:$0xff] %vm355_vm8, %v1140_v13  ;;  %v1311_v17 = vadd.f32 %v1301_v16, %v1264_v15 }
 0x137   : > { %v2416_v18 = vpop.f32.mrf.mxu0  ;;  %v1131_v19 = vld [vmem:[#allocation2 + $0x48] sm:$0xff]  ;;  %v2422_v20 = vpop.f32.mrf.mxu1 }
 0x138   : > { %v1141_v21 = vadd.f32 %v1131_v19, %v1118_v14  ;;  %1321 = vst.msk [vmem:[#allocation2 + $0x8] sm:$0xff] %vm355_vm8, %v1311_v17 }
 0x139   : > { %v1438_v22 = vpop.f32.mrf.mxu0  ;;  %v1269_v23 = vpop.f32.mrf.mxu1  ;;  %v1307_v0 = vld [vmem:[#allocation2 + $0x38] sm:$0xff] }
 0x13a   : > { %1151 = vst.msk [vmem:[#allocation2 + $0x48] sm:$0xff] %vm355_vm8, %v1141_v21  ;;  %v1312_v25 = vadd.f32 %v1302_v24, %v1269_v23 }
 0x13b   : > { %v2443_v26 = vpop.f32.mrf.mxu0  ;;  %v1477_v27 = vld [vmem:[#allocation2] sm:$0xff]  ;;  %v2425_v28 = vpop.f32.mrf.mxu1 }
 0x13c   : > { %1322 = vst.msk [vmem:[#allocation2 + $0x10] sm:$0xff] %vm355_vm8, %v1312_v25  ;;  %v1487_v29 = vadd.f32 %v1477_v27, %v1438_v22 }
 0x13d   : > { %v1441_v30 = vpop.f32.mrf.mxu0  ;;  %v1272_v31 = vpop.f32.mrf.mxu1  ;;  %v1308_v8 = vld [vmem:[#allocation2 + $0x40] sm:$0xff] }
 0x13e   : > { %1497 = vst.msk [vmem:[#allocation2] sm:$0xff] %vm355_vm8, %v1487_v29  ;;  %v1313_v32 = vadd.f32 %v1303_v1, %v1272_v31 }
 0x13f   : > { %v2444_v33 = vpop.f32.mrf.mxu0  ;;  %v1478_v34 = vld [vmem:[#allocation2 + $0x8] sm:$0xff]  ;;  %v2426_v35 = vpop.f32.mrf.mxu1 }
 0x140   : > { %1323 = vst.msk [vmem:[#allocation2 + $0x18] sm:$0xff] %vm355_vm8, %v1313_v32  ;;  %v1488_v36 = vadd.f32 %v1478_v34, %v1441_v30 }
 0x141   : > { %v1446_v37 = vpop.f32.mrf.mxu0  ;;  %v1277_v38 = vpop.f32.mrf.mxu1  ;;  %v1309_v16 = vld [vmem:[#allocation2 + $0x48] sm:$0xff] }
 0x142   : > { %1498 = vst.msk [vmem:[#allocation2 + $0x8] sm:$0xff] %vm355_vm8, %v1488_v36  ;;  %v1314_v41 = vadd.f32 %v1304_v40, %v1277_v38 }
 0x143   : > { %v2447_v42 = vpop.f32.mrf.mxu0  ;;  %v1479_v43 = vld [vmem:[#allocation2 + $0x10] sm:$0xff]  ;;  %v2429_v44 = vpop.f32.mrf.mxu1 }
 0x144   : > { %1324 = vst.msk [vmem:[#allocation2 + $0x20] sm:$0xff] %vm355_vm8, %v1314_v41  ;;  %v1489_v45 = vadd.f32 %v1479_v43, %v1446_v37 }
 0x145   : > { %v1449_v47 = vpop.f32.mrf.mxu0  ;;  %v1280_v48 = vpop.f32.mrf.mxu1  ;;  %v1697_v24 = vld [vmem:[#allocation2] sm:$0xff] }
 0x146   : > { %1499 = vst.msk [vmem:[#allocation2 + $0x10] sm:$0xff] %vm355_vm8, %v1489_v45  ;;  %v1315_v51 = vadd.f32 %v1305_v50, %v1280_v48 }
 0x147   : > { %v2448_v52 = vpop.f32.mrf.mxu0  ;;  %v1480_v53 = vld [vmem:[#allocation2 + $0x18] sm:$0xff]  ;;  %v2430_v54 = vpop.f32.mrf.mxu1 }
 0x148   : > { %1325 = vst.msk [vmem:[#allocation2 + $0x28] sm:$0xff] %vm355_vm8, %v1315_v51  ;;  %v1490_v55 = vadd.f32 %v1480_v53, %v1449_v47 }
 0x149   : > { %v1454_v56 = vpop.f32.mrf.mxu0  ;;  %v1285_v39 = vpop.f32.mrf.mxu1  ;;  %v1698_v1 = vld [vmem:[#allocation2 + $0x8] sm:$0xff] }
 0x14a   : > { %1500 = vst.msk [vmem:[#allocation2 + $0x18] sm:$0xff] %vm355_vm8, %v1490_v55  ;;  %v1316_v46 = vadd.f32 %v1306_v57, %v1285_v39 }
 0x14b   : > { %v2451_v58 = vpop.f32.mrf.mxu0  ;;  %v1481_v59 = vld [vmem:[#allocation2 + $0x20] sm:$0xff]  ;;  %v2433_v60 = vpop.f32.mrf.mxu1 }
 0x14c   : > { %1326 = vst.msk [vmem:[#allocation2 + $0x30] sm:$0xff] %vm355_vm8, %v1316_v46  ;;  %v1491_v61 = vadd.f32 %v1481_v59, %v1454_v56  ;;  %v3023_v59 = vld [vmem:[%s3086_s2] ss:$0 sm:$0xff] }
 0x14d   : > { %v1457_v62 = vpop.f32.mrf.mxu0  ;;  %v1288_v63 = vpop.f32.mrf.mxu1  ;;  %v1699_v40 = vld [vmem:[#allocation2 + $0x10] sm:$0xff] }
 0x14e   : > { %1501 = vst.msk [vmem:[#allocation2 + $0x20] sm:$0xff] %vm355_vm8, %v1491_v61  ;;  %v1317_v2 = vadd.f32 %v1307_v0, %v1288_v63 }
 0x14f   : > { %v2452_v49 = vpop.f32.mrf.mxu0  ;;  %v1482_v3 = vld [vmem:[#allocation2 + $0x28] sm:$0xff]  ;;  %v2434_v4 = vpop.f32.mrf.mxu1 }
 0x150   : > { %1327 = vst.msk [vmem:[#allocation2 + $0x38] sm:$0xff] %vm355_vm8, %v1317_v2  ;;  %v1492_v5 = vadd.f32 %v1482_v3, %v1457_v62 }
 0x151   : > { %v1462_v6 = vpop.f32.mrf.mxu0  ;;  %v1293_v7 = vpop.f32.mrf.mxu1  ;;  %v1700_v50 = vld [vmem:[#allocation2 + $0x18] sm:$0xff] }
 0x152   : > { %1502 = vst.msk [vmem:[#allocation2 + $0x28] sm:$0xff] %vm355_vm8, %v1492_v5  ;;  %v1318_v9 = vadd.f32 %v1308_v8, %v1293_v7 }
 0x153   : > { %v2455_v10 = vpop.f32.mrf.mxu0  ;;  %v1483_v11 = vld [vmem:[#allocation2 + $0x30] sm:$0xff]  ;;  %v2437_v12 = vpop.f32.mrf.mxu1 }
 0x154   : > { %1328 = vst.msk [vmem:[#allocation2 + $0x40] sm:$0xff] %vm355_vm8, %v1318_v9  ;;  %v1493_v13 = vadd.f32 %v1483_v11, %v1462_v6 }
 0x155   : > { %v1465_v14 = vpop.f32.mrf.mxu0  ;;  %v1296_v15 = vpop.f32.mrf.mxu1  ;;  %v1701_v57 = vld [vmem:[#allocation2 + $0x20] sm:$0xff] }
 0x156   : > { %1503 = vst.msk [vmem:[#allocation2 + $0x30] sm:$0xff] %vm355_vm8, %v1493_v13  ;;  %v1319_v17 = vadd.f32 %v1309_v16, %v1296_v15 }
 0x157   : > { %v2456_v18 = vpop.f32.mrf.mxu0  ;;  %v1484_v19 = vld [vmem:[#allocation2 + $0x38] sm:$0xff]  ;;  %v2438_v20 = vpop.f32.mrf.mxu1 }
 0x158   : > { %1329 = vst.msk [vmem:[#allocation2 + $0x48] sm:$0xff] %vm355_vm8, %v1319_v17  ;;  %v1494_v21 = vadd.f32 %v1484_v19, %v1465_v14 }
 0x159   : > { %v1470_v22 = vpop.f32.mrf.mxu0  ;;  %v1658_v23 = vpop.f32.mrf.mxu1  ;;  %v1702_v49 = vld [vmem:[#allocation2 + $0x28] sm:$0xff] }
 0x15a   : > { %1504 = vst.msk [vmem:[#allocation2 + $0x38] sm:$0xff] %vm355_vm8, %v1494_v21  ;;  %v1707_v25 = vadd.f32 %v1697_v24, %v1658_v23 }
 0x15b   : > { %v2459_v26 = vpop.f32.mrf.mxu0  ;;  %v1485_v27 = vld [vmem:[#allocation2 + $0x40] sm:$0xff]  ;;  %v2465_v28 = vpop.f32.mrf.mxu1 }
 0x15c   : > { %v1495_v29 = vadd.f32 %v1485_v27, %v1470_v22  ;;  %1717 = vst.msk [vmem:[#allocation2] sm:$0xff] %vm355_vm8, %v1707_v25 }
 0x15d   : > { %v1473_v30 = vpop.f32.mrf.mxu0  ;;  %v1661_v31 = vpop.f32.mrf.mxu1  ;;  %v1703_v13 = vld [vmem:[#allocation2 + $0x30] sm:$0xff] }
 0x15e   : > { %1505 = vst.msk [vmem:[#allocation2 + $0x40] sm:$0xff] %vm355_vm8, %v1495_v29  ;;  %v1708_v32 = vadd.f32 %v1698_v1, %v1661_v31 }
 0x15f   : > { %v2460_v33 = vpop.f32.mrf.mxu0  ;;  %v1486_v34 = vld [vmem:[#allocation2 + $0x48] sm:$0xff]  ;;  %v2466_v35 = vpop.f32.mrf.mxu1 }
 0x160   : > { %v1496_v36 = vadd.f32 %v1486_v34, %v1473_v30  ;;  %1718 = vst.msk [vmem:[#allocation2 + $0x8] sm:$0xff] %vm355_vm8, %v1708_v32 }
 0x161   : > { %v1836_v37 = vpop.f32.mrf.mxu0  ;;  %v1666_v38 = vpop.f32.mrf.mxu1  ;;  %v1704_v25 = vld [vmem:[#allocation2 + $0x38] sm:$0xff] }
 0x162   : > { %1506 = vst.msk [vmem:[#allocation2 + $0x48] sm:$0xff] %vm355_vm8, %v1496_v36  ;;  %v1709_v41 = vadd.f32 %v1699_v40, %v1666_v38 }
 0x163   : > { %v2487_v42 = vpop.f32.mrf.mxu0  ;;  %v1875_v43 = vld [vmem:[#allocation2] sm:$0xff]  ;;  %v2469_v44 = vpop.f32.mrf.mxu1 }
 0x164   : > { %1719 = vst.msk [vmem:[#allocation2 + $0x10] sm:$0xff] %vm355_vm8, %v1709_v41  ;;  %v1885_v45 = vadd.f32 %v1875_v43, %v1836_v37 }
 0x165   : > { %v1839_v47 = vpop.f32.mrf.mxu0  ;;  %v1669_v48 = vpop.f32.mrf.mxu1  ;;  %v1705_v36 = vld [vmem:[#allocation2 + $0x40] sm:$0xff] }
 0x166   : > { %1895 = vst.msk [vmem:[#allocation2] sm:$0xff] %vm355_vm8, %v1885_v45  ;;  %v1710_v51 = vadd.f32 %v1700_v50, %v1669_v48 }
 0x167   : > { %v2488_v52 = vpop.f32.mrf.mxu0  ;;  %v1876_v53 = vld [vmem:[#allocation2 + $0x8] sm:$0xff]  ;;  %v2470_v54 = vpop.f32.mrf.mxu1 }
 0x168   : > { %1720 = vst.msk [vmem:[#allocation2 + $0x18] sm:$0xff] %vm355_vm8, %v1710_v51  ;;  %v1886_v55 = vadd.f32 %v1876_v53, %v1839_v47 }
 0x169   : > { %v1844_v56 = vpop.f32.mrf.mxu0  ;;  %v1674_v39 = vpop.f32.mrf.mxu1  ;;  %v1706_v51 = vld [vmem:[#allocation2 + $0x48] sm:$0xff] }
 0x16a   : > { %1896 = vst.msk [vmem:[#allocation2 + $0x8] sm:$0xff] %vm355_vm8, %v1886_v55  ;;  %v1711_v46 = vadd.f32 %v1701_v57, %v1674_v39 }
 0x16b   : > { %v2491_v58 = vpop.f32.mrf.mxu0  ;;  %v1877_v60 = vld [vmem:[#allocation2 + $0x10] sm:$0xff]  ;;  %v2473_v61 = vpop.f32.mrf.mxu1 }
 0x16c   : > { %1721 = vst.msk [vmem:[#allocation2 + $0x20] sm:$0xff] %vm355_vm8, %v1711_v46  ;;  %v1887_v62 = vadd.f32 %v1877_v60, %v1844_v56 }
 0x16d   : > { %v1847_v63 = vpop.f32.mrf.mxu0  ;;  %v1905_v0 = vld [vmem:[#allocation2] sm:$0xff]  ;;  %v1677_v2 = vpop.f32.mrf.mxu1 }
 0x16e   : > { %v1922_v3 = vadd.f32 %v3023_v59, %v1905_v0  ;;  %1897 = vst.msk [vmem:[#allocation2 + $0x10] sm:$0xff] %vm355_vm8, %v1887_v62  ;;  %v1712_v4 = vadd.f32 %v1702_v49, %v1677_v2 }
 0x16f   : > { %v2492_v5 = vpop.f32.mrf.mxu0  ;;  %v1878_v6 = vld [vmem:[#allocation2 + $0x18] sm:$0xff]  ;;  %v2474_v7 = vpop.f32.mrf.mxu1 }
 0x170   : > { %v1932_v8 = vmax.f32 %v1922_v3, 0.0  ;;  %1722 = vst.msk [vmem:[#allocation2 + $0x28] sm:$0xff] %vm355_vm8, %v1712_v4  ;;  %v1888_v9 = vadd.f32 %v1878_v6, %v1847_v63 }
 0x171   : > { %v1852_v10 = vpop.f32.mrf.mxu0  ;;  %v1906_v11 = vld [vmem:[#allocation2 + $0x8] sm:$0xff]  ;;  %v1682_v12 = vpop.f32.mrf.mxu1 }
 0x172   : > { %v2243_v14 = vpack.c.bf16 %v1932_v8, %v1932_v8  ;;  %v1923_v15 = vadd.f32 %v3023_v59, %v1906_v11  ;;  %1898 = vst.msk [vmem:[#allocation2 + $0x18] sm:$0xff] %vm355_vm8, %v1888_v9  ;;  %v1713_v16 = vadd.f32 %v1703_v13, %v1682_v12 }
 0x173   : > { %v2495_v17 = vpop.f32.mrf.mxu0  ;;  %v1879_v18 = vld [vmem:[#allocation2 + $0x20] sm:$0xff]  ;;  %v2477_v19 = vpop.f32.mrf.mxu1 }
 0x174   : > { %1983 = vst.msk [vmem:[%s3033_s12] sm:$0xf] %vm1982_vm9, %v2243_v14  ;;  %v1933_v20 = vmax.f32 %v1923_v15, 0.0  ;;  %v1889_v21 = vadd.f32 %v1879_v18, %v1852_v10 }
 0x175   : > { %1723 = vst.msk [vmem:[#allocation2 + $0x30] sm:$0xff] %vm355_vm8, %v1713_v16  ;;  %v1855_v22 = vpop.f32.mrf.mxu0  ;;  %v1907_v23 = vld [vmem:[#allocation2 + $0x10] sm:$0xff]  ;;  %v1685_v24 = vpop.f32.mrf.mxu1 }
 0x176   : > { %v2244_v26 = vpack.c.bf16 %v1933_v20, %v1933_v20  ;;  %v1924_v27 = vadd.f32 %v3023_v59, %v1907_v23  ;;  %1899 = vst.msk [vmem:[#allocation2 + $0x20] sm:$0xff] %vm355_vm8, %v1889_v21  ;;  %v1714_v28 = vadd.f32 %v1704_v25, %v1685_v24 }
 0x177   : > { %v2496_v29 = vpop.f32.mrf.mxu0  ;;  %v1880_v30 = vld [vmem:[#allocation2 + $0x28] sm:$0xff]  ;;  %v2478_v31 = vpop.f32.mrf.mxu1 }
 0x178   : > { %1984 = vst.msk [vmem:[%s3033_s12 + $0x4] sm:$0xf] %vm1982_vm9, %v2244_v26  ;;  %v1934_v1 = vmax.f32 %v1924_v27, 0.0  ;;  %v1890_v32 = vadd.f32 %v1880_v30, %v1855_v22 }
 0x179   : > { %1724 = vst.msk [vmem:[#allocation2 + $0x38] sm:$0xff] %vm355_vm8, %v1714_v28  ;;  %v1860_v33 = vpop.f32.mrf.mxu0  ;;  %v1908_v34 = vld [vmem:[#allocation2 + $0x18] sm:$0xff]  ;;  %v1690_v35 = vpop.f32.mrf.mxu1 }
 0x17a   : > { %v2245_v37 = vpack.c.bf16 %v1934_v1, %v1934_v1  ;;  %v1925_v38 = vadd.f32 %v3023_v59, %v1908_v34  ;;  %1900 = vst.msk [vmem:[#allocation2 + $0x28] sm:$0xff] %vm355_vm8, %v1890_v32  ;;  %v1715_v40 = vadd.f32 %v1705_v36, %v1690_v35 }
 0x17b   : > { %v2499_v41 = vpop.f32.mrf.mxu0  ;;  %v2481_v43 = vpop.f32.mrf.mxu1 }
 0x17c   : > { %v1881_v42 = vld [vmem:[#allocation2 + $0x30] sm:$0xff]  ;;  %1985 = vst.msk [vmem:[%s3033_s12 + $0x8] sm:$0xf] %vm1982_vm9, %v2245_v37  ;;  %v1935_v44 = vmax.f32 %v1925_v38, 0.0 }
 0x17d   : > { %1725 = vst.msk [vmem:[#allocation2 + $0x40] sm:$0xff] %vm355_vm8, %v1715_v40  ;;  %v1891_v45 = vadd.f32 %v1881_v42, %v1860_v33  ;;  %v1863_v47 = vpop.f32.mrf.mxu0  ;;  %v1909_v48 = vld [vmem:[#allocation2 + $0x20] sm:$0xff]  ;;  %v1693_v50 = vpop.f32.mrf.mxu1 }
 0x17e   : > { %v2246_v52 = vpack.c.bf16 %v1935_v44, %v1935_v44  ;;  %v1926_v53 = vadd.f32 %v3023_v59, %v1909_v48  ;;  %v1716_v54 = vadd.f32 %v1706_v51, %v1693_v50 }
 0x17f   : > { %1901 = vst.msk [vmem:[#allocation2 + $0x30] sm:$0xff] %vm355_vm8, %v1891_v45  ;;  %v2500_v55 = vpop.f32.mrf.mxu0  ;;  %v2482_v39 = vpop.f32.mrf.mxu1 }
 0x180   : > { %v1882_v56 = vld [vmem:[#allocation2 + $0x38] sm:$0xff]  ;;  %1986 = vst.msk [vmem:[%s3033_s12 + $0xc] sm:$0xf] %vm1982_vm9, %v2246_v52  ;;  %v1936_v57 = vmax.f32 %v1926_v53, 0.0 }
 0x181   : > { %1726 = vst.msk [vmem:[#allocation2 + $0x48] sm:$0xff] %vm355_vm8, %v1716_v54  ;;  %v1892_v46 = vadd.f32 %v1882_v56, %v1863_v47  ;;  %v1868_v58 = vpop.f32.mrf.mxu0  ;;  %v1910_v60 = vld [vmem:[#allocation2 + $0x28] sm:$0xff] }
 0x182   : > { %v2247_v61 = vpack.c.bf16 %v1936_v57, %v1936_v57  ;;  %v1927_v62 = vadd.f32 %v3023_v59, %v1910_v60 }
 0x183   : > { %1902 = vst.msk [vmem:[#allocation2 + $0x38] sm:$0xff] %vm355_vm8, %v1892_v46  ;;  %v2503_v63 = vpop.f32.mrf.mxu0 }
 0x184   : > { %v1883_v0 = vld [vmem:[#allocation2 + $0x40] sm:$0xff]  ;;  %1987 = vst.msk [vmem:[%s3033_s12 + $0x10] sm:$0xf] %vm1982_vm9, %v2247_v61  ;;  %v1937_v2 = vmax.f32 %v1927_v62, 0.0 }
 0x185   : > { %v1893_v49 = vadd.f32 %v1883_v0, %v1868_v58  ;;  %v1871_v3 = vpop.f32.mrf.mxu0 }
 0x186   : > { %v1911_v4 = vld [vmem:[#allocation2 + $0x30] sm:$0xff]  ;;  %v2248_v5 = vpack.c.bf16 %v1937_v2, %v1937_v2 }
 0x187   : > { %v1928_v6 = vadd.f32 %v3023_v59, %v1911_v4  ;;  %1903 = vst.msk [vmem:[#allocation2 + $0x40] sm:$0xff] %vm355_vm8, %v1893_v49  ;;  %v2504_v7 = vpop.f32.mrf.mxu0 }
 0x188   : > { %v1884_v8 = vld [vmem:[#allocation2 + $0x48] sm:$0xff]  ;;  %1988 = vst.msk [vmem:[%s3033_s12 + $0x14] sm:$0xf] %vm1982_vm9, %v2248_v5 }
 0x189   : > { %v1938_v9 = vmax.f32 %v1928_v6, 0.0  ;;  %v1894_v10 = vadd.f32 %v1884_v8, %v1871_v3 }
 0x18a   : > { %v1912_v11 = vld [vmem:[#allocation2 + $0x38] sm:$0xff] }
 0x18b   : > { %v2249_v12 = vpack.c.bf16 %v1938_v9, %v1938_v9  ;;  %v1929_v13 = vadd.f32 %v3023_v59, %v1912_v11  ;;  %1904 = vst.msk [vmem:[#allocation2 + $0x48] sm:$0xff] %vm355_vm8, %v1894_v10 }
 0x18d   : > { %1989 = vst.msk [vmem:[%s3033_s12 + $0x18] sm:$0xf] %vm1982_vm9, %v2249_v12  ;;  %v1939_v14 = vmax.f32 %v1929_v13, 0.0 }
 0x18e   : > { %v1913_v15 = vld [vmem:[#allocation2 + $0x40] sm:$0xff] }
 0x18f   : > { %v2250_v16 = vpack.c.bf16 %v1939_v14, %v1939_v14  ;;  %v1930_v17 = vadd.f32 %v3023_v59, %v1913_v15 }
 0x191   : > { %1990 = vst.msk [vmem:[%s3033_s12 + $0x1c] sm:$0xf] %vm1982_vm9, %v2250_v16  ;;  %v1940_v18 = vmax.f32 %v1930_v17, 0.0 }
 0x192   : > { %v1914_v19 = vld [vmem:[#allocation2 + $0x48] sm:$0xff] }
 0x193   : > { %v2251_v20 = vpack.c.bf16 %v1940_v18, %v1940_v18  ;;  %v1931_v21 = vadd.f32 %v3023_v59, %v1914_v19 }
 0x195   : > { %1991 = vst.msk [vmem:[%s3033_s12 + $0x20] sm:$0xf] %vm1982_vm9, %v2251_v20  ;;  %v1941_v22 = vmax.f32 %v1931_v21, 0.0 }
 0x197   : > { %v2252_v23 = vpack.c.bf16 %v1941_v22, %v1941_v22 }
 0x199   : > { %1992 = vst.msk [vmem:[%s3033_s12 + $0x24] sm:$0xf] %vm1982_vm9, %v2252_v23 }
 0x19a PF: > { %s13_s14 = sadd.s32 1, %s2619_s14   ;;  %s3088_s12 = smov %s2615_s13 }
 0x19b   : > { %p10_p5 = scmp.ge.s32.totalorder %s13_s14, 4   ;;  %s3089_s13 = smov %s3091_s15 }
 0x19d   :  { %12 = sbr.rel (!%p10_p5) target bundleno = 2 (0x2), region = 76 }

</bundles_post_ra>
